<compile_context>
chip_gen: v5e
topology: v5e:2x2
jax: 0.10.0
libtpu: 0.0.40
codegen_flags: <defaults>
</compile_context>

<pallas_src>
import numpy as np
import jax
import jax.numpy as jnp
from jax.experimental import pallas as pl
from jax.experimental.pallas import tpu as pltpu  # noqa: F401  (kept for TPU-specific tweaks)

# ----------------------------- config ---------------------------------------
B = 2            # batch
T = 8            # seq len (toy model runs with seq_len == max_seq_len)
E = 32           # embedding_dim
H = 4            # num_heads
HD = 8           # head_dim   (H * HD == E)
G = 2            # num_query_groups (GQA)
Q_PER_KV = H // G
FF = 64          # intermediate_size
V = 128          # vocab_size
MAX_SEQ = T
ROPE_DIM = HD    # rotary_percentage = 1.0
EPS = 1e-6       # RMSNorm epsilon

BT = B * T
QW = H * HD                 # 32 query columns
KW = G * HD                 # 16 key columns
VW = G * HD                 # 16 value columns
QKV_W = QW + KW + VW        # 64
LANES = 128                 # lane width of both packed slabs

# -- static weight-slab row layout (every piece starts at lane 0, 8-aligned rows) --
W_EXT_R = 0                       # (E, 128)  fused [q|k|v|q_rot|k_rot|0] projection
W13_R   = W_EXT_R + E             # (E, 128)  fused [gate|up] FFN projection
WLM_R   = W13_R + E               # (E, 128)  lm_head
W2_R    = WLM_R + E               # (FF, E)   FFN down projection
WO_R    = W2_R + FF               # (E, E)    attention output projection
NORM_R  = WO_R + E                # rows: +0 pre-attn, +1 post-attn, +2 final RMSNorm w
WSLAB_ROWS = NORM_R + 8           # 200 rows (multiple of 8)

# -- dynamic-slab row layout --
X_R    = 0                        # (BT, E)   embedded tokens
CTAB_R = BT                       # (BT, 128) merged RoPE cos/sin FMA table
MASK_R = 2 * BT                   # (T, T)    causal mask (0 / -inf)
DYN_ROWS = MASK_R + T             # 40 rows (multiple of 8)


# ----------------------- shared math helpers (pure jnp) ----------------------
def _rms_norm(x, w):
    # x: (N, E), w: (1, E) -- matches ai_edge_torch RMSNorm (mean of squares).
    var = jnp.mean(x * x, axis=-1, keepdims=True)
    return x * jax.lax.rsqrt(var + EPS) * w


def _apply_rope(x, cos, sin):
    # reference-only rotate-half RoPE; x: (T, HD); cos/sin: (T, HD//2)
    half = HD // 2
    x1, x2 = x[:, :half], x[:, half:]
    return jnp.concatenate([x1 * cos - x2 * sin, x2 * cos + x1 * sin], axis=-1)


# ------------------------------ Pallas kernel --------------------------------
def toy_kernel(dyn_ref, w_ref, out_ref):
    # dynamic slab
    x    = dyn_ref[X_R:X_R + BT, 0:E]                  # (BT, E)
    ctab = dyn_ref[CTAB_R:CTAB_R + BT, :]              # (BT, 128)
    mask = dyn_ref[MASK_R:MASK_R + T, 0:T]             # (T, T), 0 / -inf causal mask

    # static weight slab (single DMA; static ref-window reads below are free views)
    w_ext  = w_ref[W_EXT_R:W_EXT_R + E, :]             # (E, 128)
    w13    = w_ref[W13_R:W13_R + E, :]                 # (E, 2*FF)
    w_lm   = w_ref[WLM_R:WLM_R + E, :]                 # (E, V)
    w2     = w_ref[W2_R:W2_R + FF, 0:E]                # (FF, E)
    wo     = w_ref[WO_R:WO_R + E, 0:E]                 # (H*HD, E)
    w_pre  = w_ref[NORM_R + 0:NORM_R + 1, 0:E]         # (1, E)
    w_post = w_ref[NORM_R + 1:NORM_R + 2, 0:E]
    w_fin  = w_ref[NORM_R + 2:NORM_R + 3, 0:E]

    # ---- pre-attention RMSNorm ----
    xn = _rms_norm(x, w_pre)

    # ---- fused lane-dense projection [q | k | v | q_rot | k_rot | 0] ----
    # (rotate-half baked into weight columns, 1/sqrt(HD) into q columns); RoPE is ONE
    # full 128-lane multiply by the merged cos/sin table + one 64-lane fold.
    qkv_ext = jnp.dot(xn, w_ext, preferred_element_type=jnp.float32)     # (BT, 128)
    prod = qkv_ext * ctab
    qkv = prod[:, :QKV_W] + prod[:, QKV_W:2 * QKV_W]                     # (BT, 64)

    # ---- causal attention: H independent rank-3 einsums on static lane slices ----
    y_cols = []
    for h in range(H):
        g = h // Q_PER_KV
        qh = qkv[:, h * HD:(h + 1) * HD].reshape(B, T, HD)
        kh = qkv[:, QW + g * HD:QW + (g + 1) * HD].reshape(B, T, HD)
        vh = qkv[:, QW + KW + g * HD:QW + KW + (g + 1) * HD].reshape(B, T, HD)
        s = jnp.einsum('btd,bsd->bts', qh, kh,
                       preferred_element_type=jnp.float32) + mask        # (B, T, T)
        s = s - jnp.max(s, axis=-1, keepdims=True)
        p = jnp.exp(s)
        yh = jnp.einsum('bts,bsd->btd', p, vh,
                        preferred_element_type=jnp.float32)              # (B, T, HD)
        yh = yh * pl.reciprocal(jnp.sum(p, axis=-1, keepdims=True))      # exact, post-PV
        y_cols.append(yh.reshape(BT, HD))
    y = jnp.concatenate(y_cols, axis=1)                                  # (BT, E) head-major

    # ---- single output projection (K=32) + residual ----
    x = x + jnp.dot(y, wo, preferred_element_type=jnp.float32)

    # ---- post-attention RMSNorm + fused gated-SiLU FFN + residual ----
    xn2 = _rms_norm(x, w_post)
    h13 = jnp.dot(xn2, w13, preferred_element_type=jnp.float32)          # (BT, 2*FF)
    g1, up = h13[:, :FF], h13[:, FF:]
    x = x + jnp.dot(g1 * jax.nn.sigmoid(g1) * up, w2,
                    preferred_element_type=jnp.float32)

    # ---- final RMSNorm + lm_head (lane-dense (BT, 128) store) ----
    xf = _rms_norm(x, w_fin)
    out_ref[...] = jnp.dot(xf, w_lm, preferred_element_type=jnp.float32)


# ------------------------------ glue / wrapper -------------------------------
def build_rope_cache(size, dim, base=10000.0):
    theta = 1.0 / (base ** (np.arange(0, dim, 2, dtype=np.float32) / dim))
    seq = np.arange(size, dtype=np.float32)
    idx_theta = np.outer(seq, theta)                   # (size, dim//2)
    return jnp.asarray(np.cos(idx_theta)), jnp.asarray(np.sin(idx_theta))


def build_causal_mask_cache(size):
    m = np.triu(np.full((size, size), -np.inf, dtype=np.float32), k=1)
    return jnp.asarray(m)                              # 0 on/below diag, -inf above


ROPE_COS, ROPE_SIN = build_rope_cache(MAX_SEQ, ROPE_DIM)
MASK_CACHE = build_causal_mask_cache(MAX_SEQ)


def make_params(key):
    ks = jax.random.split(key, 10)
    def init(k, shape, scale=0.05):
        return jax.random.normal(k, shape, jnp.float32) * scale
    total_qkv_rows = (H + 2 * G) * HD
    return dict(
        emb=init(ks[0], (V, E), 1.0),                  # nn.Embedding(vocab, embed)
        wqkv=init(ks[1], (total_qkv_rows, E)),         # fused qkv Linear (out, in), no bias
        wo=init(ks[2], (E, E)),                        # output_projection
        w1=init(ks[3], (FF, E)),                       # gate proj
        w3=init(ks[4], (FF, E)),                       # up proj
        w2=init(ks[5], (E, FF)),                       # down proj
        w_pre=1.0 + init(ks[6], (E,), 0.1),            # RMSNorm weights
        w_post=1.0 + init(ks[7], (E,), 0.1),
        w_fin=1.0 + init(ks[8], (E,), 0.1),
        w_lm=init(ks[9], (V, E)),                      # lm_head, bias=False
    )


def _split_qkv(wqkv):
    # Mirrors qkv.view(B, T, G, q_per_kv + 2, HD).split((q_per_kv, 1, 1), dim=-2)
    # TODO(synk): group-major fused-qkv packing assumed; verify against the real
    # ai_edge_torch module separately (kernel + in-file reference share the assumption).
    total = Q_PER_KV + 2
    w = wqkv.reshape(G, total, HD, E)
    wq = w[:, :Q_PER_KV].reshape(H * HD, E)            # head-major query rows
    wk = w[:, Q_PER_KV].reshape(G * HD, E)
    wv = w[:, Q_PER_KV + 1].reshape(G * HD, E)
    return wq, wk, wv


def _rot_half_cols(w):
    # w: (E, n*HD) column-chunked per head; returns W_rot such that
    # (x @ W_rot) == swap_halves(x @ W) per HD-wide chunk.
    n = w.shape[1] // HD
    w4 = w.reshape(E, n, 2, HD // 2)
    return jnp.concatenate([w4[:, :, 1, :], w4[:, :, 0, :]], axis=2).reshape(E, n * HD)


def pack_weights(params):
    """One-time packing of every weight / norm vector into a single lane-dense slab."""
    wq, wk, wv = _split_qkv(params["wqkv"])
    scale = 1.0 / (HD ** 0.5)
    wqT = wq.T * scale                                 # (E, 32) attn scale folded into q
    wkT = wk.T                                         # (E, 16)
    wvT = wv.T                                         # (E, 16)
    w_ext = jnp.concatenate(
        [wqT, wkT, wvT, _rot_half_cols(wqT), _rot_half_cols(wkT),
         jnp.zeros((E, LANES - QKV_W - QW - KW), jnp.float32)], axis=1)   # (E, 128)
    w13 = jnp.concatenate([params["w1"].T, params["w3"].T], axis=1)       # (E, 2*FF)

    slab = jnp.zeros((WSLAB_ROWS, LANES), jnp.float32)
    slab = slab.at[W_EXT_R:W_EXT_R + E, :].set(w_ext)
    slab = slab.at[W13_R:W13_R + E, :].set(w13)
    slab = slab.at[WLM_R:WLM_R + E, :].set(params["w_lm"].T)              # (E, V)
    slab = slab.at[W2_R:W2_R + FF, 0:E].set(params["w2"].T)               # (FF, E)
    slab = slab.at[WO_R:WO_R + E, 0:E].set(params["wo"].T)                # (H*HD, E)
    slab = slab.at[NORM_R + 0, 0:E].set(params["w_pre"])
    slab = slab.at[NORM_R + 1, 0:E].set(params["w_post"])
    slab = slab.at[NORM_R + 2, 0:E].set(params["w_fin"])
    return slab


def _rope_table(cos, sin):
    # Merged (BT, 128) cos/sin FMA table: lanes [0:64] multiply the [q|k|v] columns,
    # lanes [64:128] multiply the [q_rot|k_rot|0] columns (rotate-half sign baked in).
    cos_c = jnp.concatenate([cos, cos], axis=1)                           # (T, HD)
    sin_c = jnp.concatenate([-sin, sin], axis=1)                          # (T, HD)
    main = jnp.concatenate([jnp.tile(cos_c, (1, H)), jnp.tile(cos_c, (1, G)),
                            jnp.ones((T, VW), jnp.float32)], axis=1)      # (T, 64)
    rot = jnp.concatenate([jnp.tile(sin_c, (1, H)), jnp.tile(sin_c, (1, G)),
                           jnp.zeros((T, VW), jnp.float32)], axis=1)      # (T, 64)
    return jnp.tile(jnp.concatenate([main, rot], axis=1), (B, 1))         # (BT, 128)


@jax.jit
def toy_model_forward(idx, input_pos, emb, wslab):
    # TODO(synk): tok_embedding gather stays in plain-JAX glue (data-dependent row
    # gather; not worth a DMA-gather kernel at this size).
    x = jnp.take(emb, idx, axis=0).astype(jnp.float32).reshape(BT, E)
    cos = ROPE_COS[input_pos]                          # (T, HD//2)
    sin = ROPE_SIN[input_pos]
    mask = MASK_CACHE[input_pos][:, :MAX_SEQ]          # (T, T)

    dyn = jnp.zeros((DYN_ROWS, LANES), jnp.float32)
    dyn = dyn.at[X_R:X_R + BT, 0:E].set(x)
    dyn = dyn.at[CTAB_R:CTAB_R + BT, :].set(_rope_table(cos, sin))
    dyn = dyn.at[MASK_R:MASK_R + T, 0:T].set(mask)

    out = pl.pallas_call(
        toy_kernel,
        out_shape=jax.ShapeDtypeStruct((BT, V), jnp.float32),
        in_specs=[pl.BlockSpec((DYN_ROWS, LANES), lambda: (0, 0)),
                  pl.BlockSpec((WSLAB_ROWS, LANES), lambda: (0, 0))],
        out_specs=pl.BlockSpec((BT, V), lambda: (0, 0)),
    )(dyn, wslab)
    return out.reshape(B, T, V)


# ------------------------- pure-JAX reference (for check) --------------------
def reference_forward(idx, input_pos, params):
    x = jnp.take(params["emb"], idx, axis=0).astype(jnp.float32)         # (B, T, E)
    cos = ROPE_COS[input_pos]
    sin = ROPE_SIN[input_pos]
    mask = MASK_CACHE[input_pos][:, :MAX_SEQ]
    wq, wk, wv = _split_qkv(params["wqkv"])
    w_pre = params["w_pre"].reshape(1, E)
    w_post = params["w_post"].reshape(1, E)
    w_fin = params["w_fin"].reshape(1, E)
    scale = 1.0 / (HD ** 0.5)

    def block(xb):                                                       # (T, E)
        xn = _rms_norm(xb, w_pre)
        q, k, v = xn @ wq.T, xn @ wk.T, xn @ wv.T
        ys = []
        for h in range(H):
            g = h // Q_PER_KV
            qh = _apply_rope(q[:, h * HD:(h + 1) * HD], cos, sin)
            kg = _apply_rope(k[:, g * HD:(g + 1) * HD], cos, sin)
            vg = v[:, g * HD:(g + 1) * HD]
            s = qh @ kg.T * scale + mask
            ys.append(jax.nn.softmax(s, axis=-1) @ vg)
        xb = xb + jnp.concatenate(ys, axis=-1) @ params["wo"].T
        xn2 = _rms_norm(xb, w_post)
        xb = xb + (jax.nn.silu(xn2 @ params["w1"].T) * (xn2 @ params["w3"].T)) @ params["w2"].T
        return _rms_norm(xb, w_fin) @ params["w_lm"].T
    return jax.vmap(block)(x)


# ------------------------------------ main -----------------------------------
if __name__ == "__main__":
    key = jax.random.PRNGKey(0)
    kp, ki = jax.random.split(key)
    params = make_params(kp)
    wslab = pack_weights(params)                       # one-time weight packing

    idx = jax.random.randint(ki, (B, T), 0, V, dtype=jnp.int32)          # token ids
    input_pos = jnp.arange(T, dtype=jnp.int32)                            # positions

    out = jax.block_until_ready(toy_model_forward(idx, input_pos, params["emb"], wslab))
    assert out.shape == (B, T, V) and out.dtype == jnp.float32

    ref = reference_forward(idx, input_pos, params)
    np.testing.assert_allclose(np.asarray(out), np.asarray(ref), rtol=2e-3, atol=2e-3)

    print("KERNEL_OK")
</pallas_src>

<mosaic_0001>
module attributes {stable_mosaic.version = 11 : i64} {
  func.func @toy_kernel(%arg0: memref<40x128xf32, #tpu.memory_space<vmem>>, %arg1: memref<200x128xf32, #tpu.memory_space<vmem>>, %arg2: memref<16x128xf32, #tpu.memory_space<vmem>>) attributes {dimension_semantics = [], scalar_prefetch = 0 : i64, scratch_operands = 0 : i64, tpu.core_type = #tpu.core_type<tc>} {
    %c0 = arith.constant 0 : index
    %c0_0 = arith.constant 0 : index
    %0 = vector.load %arg0[%c0, %c0_0] : memref<40x128xf32, #tpu.memory_space<vmem>>, vector<16x32xf32>
    %c16 = arith.constant 16 : index
    %c0_1 = arith.constant 0 : index
    %1 = vector.load %arg0[%c16, %c0_1] : memref<40x128xf32, #tpu.memory_space<vmem>>, vector<16x128xf32>
    %c32 = arith.constant 32 : index
    %c0_2 = arith.constant 0 : index
    %2 = vector.load %arg0[%c32, %c0_2] : memref<40x128xf32, #tpu.memory_space<vmem>>, vector<8x8xf32>
    %c0_3 = arith.constant 0 : index
    %c0_4 = arith.constant 0 : index
    %3 = vector.load %arg1[%c0_3, %c0_4] : memref<200x128xf32, #tpu.memory_space<vmem>>, vector<32x128xf32>
    %c32_5 = arith.constant 32 : index
    %c0_6 = arith.constant 0 : index
    %4 = vector.load %arg1[%c32_5, %c0_6] : memref<200x128xf32, #tpu.memory_space<vmem>>, vector<32x128xf32>
    %c64 = arith.constant 64 : index
    %c0_7 = arith.constant 0 : index
    %5 = vector.load %arg1[%c64, %c0_7] : memref<200x128xf32, #tpu.memory_space<vmem>>, vector<32x128xf32>
    %c96 = arith.constant 96 : index
    %c0_8 = arith.constant 0 : index
    %6 = vector.load %arg1[%c96, %c0_8] : memref<200x128xf32, #tpu.memory_space<vmem>>, vector<64x32xf32>
    %c160 = arith.constant 160 : index
    %c0_9 = arith.constant 0 : index
    %7 = vector.load %arg1[%c160, %c0_9] : memref<200x128xf32, #tpu.memory_space<vmem>>, vector<32x32xf32>
    %c192 = arith.constant 192 : index
    %c0_10 = arith.constant 0 : index
    %8 = vector.load %arg1[%c192, %c0_10] : memref<200x128xf32, #tpu.memory_space<vmem>>, vector<1x32xf32>
    %c193 = arith.constant 193 : index
    %c0_11 = arith.constant 0 : index
    %9 = vector.load %arg1[%c193, %c0_11] : memref<200x128xf32, #tpu.memory_space<vmem>>, vector<1x32xf32>
    %c194 = arith.constant 194 : index
    %c0_12 = arith.constant 0 : index
    %10 = vector.load %arg1[%c194, %c0_12] : memref<200x128xf32, #tpu.memory_space<vmem>>, vector<1x32xf32>
    %11 = arith.mulf %0, %0 : vector<16x32xf32>
    %cst = arith.constant dense<0.000000e+00> : vector<16xf32>
    %12 = vector.multi_reduction <add>, %11, %cst [1] : vector<16x32xf32> to vector<16xf32>
    %13 = vector.shape_cast %12 : vector<16xf32> to vector<16x1xf32>
    %cst_13 = arith.constant 3.200000e+01 : f32
    %14 = vector.broadcast %cst_13 : f32 to vector<16x1xf32>
    %15 = arith.divf %13, %14 : vector<16x1xf32>
    %cst_14 = arith.constant 9.99999997E-7 : f32
    %16 = vector.broadcast %cst_14 : f32 to vector<16x1xf32>
    %17 = arith.addf %15, %16 : vector<16x1xf32>
    %18 = math.rsqrt %17 : vector<16x1xf32>
    %19 = vector.broadcast %18 : vector<16x1xf32> to vector<16x32xf32>
    %20 = arith.mulf %0, %19 : vector<16x32xf32>
    %21 = vector.broadcast %8 : vector<1x32xf32> to vector<16x32xf32>
    %22 = arith.mulf %20, %21 : vector<16x32xf32>
    %cst_15 = arith.constant dense<0.000000e+00> : vector<16x128xf32>
    %23 = tpu.matmul %22, %3, %cst_15 {dimension_numbers = #tpu.dot_dimension_numbers<[1], [0], [0], [1], [0, 0, 1, 1], [], []>} : vector<16x32xf32>, vector<32x128xf32>, vector<16x128xf32> -> vector<16x128xf32>
    %24 = arith.mulf %23, %1 : vector<16x128xf32>
    %25 = vector.extract_strided_slice %24 {offsets = [0, 0], sizes = [16, 64], strides = [1, 1]} : vector<16x128xf32> to vector<16x64xf32>
    %26 = vector.extract_strided_slice %24 {offsets = [0, 64], sizes = [16, 64], strides = [1, 1]} : vector<16x128xf32> to vector<16x64xf32>
    %27 = arith.addf %25, %26 : vector<16x64xf32>
    %28 = vector.extract_strided_slice %27 {offsets = [0, 0], sizes = [16, 8], strides = [1, 1]} : vector<16x64xf32> to vector<16x8xf32>
    %29 = vector.shape_cast %28 : vector<16x8xf32> to vector<2x8x8xf32>
    %30 = vector.extract_strided_slice %27 {offsets = [0, 32], sizes = [16, 8], strides = [1, 1]} : vector<16x64xf32> to vector<16x8xf32>
    %31 = vector.shape_cast %30 : vector<16x8xf32> to vector<2x8x8xf32>
    %32 = vector.extract_strided_slice %27 {offsets = [0, 48], sizes = [16, 8], strides = [1, 1]} : vector<16x64xf32> to vector<16x8xf32>
    %33 = vector.shape_cast %32 : vector<16x8xf32> to vector<2x8x8xf32>
    "tpu.trace_start"() <{level = 10 : i32, message = "btd,bsd->bts"}> : () -> ()
    %cst_16 = arith.constant dense<0.000000e+00> : vector<2x8x8xf32>
    %34 = tpu.matmul %29, %31, %cst_16 {dimension_numbers = #tpu.dot_dimension_numbers<[2], [2], [1], [1], [0, 0, 0, 1, 1, 1], [0], [0]>} : vector<2x8x8xf32>, vector<2x8x8xf32>, vector<2x8x8xf32> -> vector<2x8x8xf32>
    "tpu.trace_stop"() : () -> ()
    %35 = vector.shape_cast %2 : vector<8x8xf32> to vector<1x8x8xf32>
    %36 = vector.broadcast %35 : vector<1x8x8xf32> to vector<2x8x8xf32>
    %37 = arith.addf %34, %36 : vector<2x8x8xf32>
    %cst_17 = arith.constant dense<0xFF800000> : vector<2x8xf32>
    %38 = vector.multi_reduction <maximumf>, %37, %cst_17 [2] : vector<2x8x8xf32> to vector<2x8xf32>
    %39 = vector.shape_cast %38 : vector<2x8xf32> to vector<2x8x1xf32>
    %40 = vector.broadcast %39 : vector<2x8x1xf32> to vector<2x8x8xf32>
    %41 = arith.subf %37, %40 : vector<2x8x8xf32>
    %42 = math.exp %41 : vector<2x8x8xf32>
    "tpu.trace_start"() <{level = 10 : i32, message = "bts,bsd->btd"}> : () -> ()
    %cst_18 = arith.constant dense<0.000000e+00> : vector<2x8x8xf32>
    %43 = tpu.matmul %42, %33, %cst_18 {dimension_numbers = #tpu.dot_dimension_numbers<[2], [1], [1], [2], [0, 0, 0, 1, 1, 2], [0], [0]>} : vector<2x8x8xf32>, vector<2x8x8xf32>, vector<2x8x8xf32> -> vector<2x8x8xf32>
    "tpu.trace_stop"() : () -> ()
    %cst_19 = arith.constant dense<0.000000e+00> : vector<2x8xf32>
    %44 = vector.multi_reduction <add>, %42, %cst_19 [2] : vector<2x8x8xf32> to vector<2x8xf32>
    %45 = vector.shape_cast %44 : vector<2x8xf32> to vector<2x8x1xf32>
    %46 = tpu.reciprocal %45 : vector<2x8x1xf32> -> vector<2x8x1xf32>
    %47 = vector.broadcast %46 : vector<2x8x1xf32> to vector<2x8x8xf32>
    %48 = arith.mulf %43, %47 : vector<2x8x8xf32>
    %49 = vector.shape_cast %48 : vector<2x8x8xf32> to vector<16x8xf32>
    %50 = vector.extract_strided_slice %27 {offsets = [0, 8], sizes = [16, 8], strides = [1, 1]} : vector<16x64xf32> to vector<16x8xf32>
    %51 = vector.shape_cast %50 : vector<16x8xf32> to vector<2x8x8xf32>
    %52 = vector.extract_strided_slice %27 {offsets = [0, 32], sizes = [16, 8], strides = [1, 1]} : vector<16x64xf32> to vector<16x8xf32>
    %53 = vector.shape_cast %52 : vector<16x8xf32> to vector<2x8x8xf32>
    %54 = vector.extract_strided_slice %27 {offsets = [0, 48], sizes = [16, 8], strides = [1, 1]} : vector<16x64xf32> to vector<16x8xf32>
    %55 = vector.shape_cast %54 : vector<16x8xf32> to vector<2x8x8xf32>
    "tpu.trace_start"() <{level = 10 : i32, message = "btd,bsd->bts"}> : () -> ()
    %cst_20 = arith.constant dense<0.000000e+00> : vector<2x8x8xf32>
    %56 = tpu.matmul %51, %53, %cst_20 {dimension_numbers = #tpu.dot_dimension_numbers<[2], [2], [1], [1], [0, 0, 0, 1, 1, 1], [0], [0]>} : vector<2x8x8xf32>, vector<2x8x8xf32>, vector<2x8x8xf32> -> vector<2x8x8xf32>
    "tpu.trace_stop"() : () -> ()
    %57 = vector.shape_cast %2 : vector<8x8xf32> to vector<1x8x8xf32>
    %58 = vector.broadcast %57 : vector<1x8x8xf32> to vector<2x8x8xf32>
    %59 = arith.addf %56, %58 : vector<2x8x8xf32>
    %cst_21 = arith.constant dense<0xFF800000> : vector<2x8xf32>
    %60 = vector.multi_reduction <maximumf>, %59, %cst_21 [2] : vector<2x8x8xf32> to vector<2x8xf32>
    %61 = vector.shape_cast %60 : vector<2x8xf32> to vector<2x8x1xf32>
    %62 = vector.broadcast %61 : vector<2x8x1xf32> to vector<2x8x8xf32>
    %63 = arith.subf %59, %62 : vector<2x8x8xf32>
    %64 = math.exp %63 : vector<2x8x8xf32>
    "tpu.trace_start"() <{level = 10 : i32, message = "bts,bsd->btd"}> : () -> ()
    %cst_22 = arith.constant dense<0.000000e+00> : vector<2x8x8xf32>
    %65 = tpu.matmul %64, %55, %cst_22 {dimension_numbers = #tpu.dot_dimension_numbers<[2], [1], [1], [2], [0, 0, 0, 1, 1, 2], [0], [0]>} : vector<2x8x8xf32>, vector<2x8x8xf32>, vector<2x8x8xf32> -> vector<2x8x8xf32>
    "tpu.trace_stop"() : () -> ()
    %cst_23 = arith.constant dense<0.000000e+00> : vector<2x8xf32>
    %66 = vector.multi_reduction <add>, %64, %cst_23 [2] : vector<2x8x8xf32> to vector<2x8xf32>
    %67 = vector.shape_cast %66 : vector<2x8xf32> to vector<2x8x1xf32>
    %68 = tpu.reciprocal %67 : vector<2x8x1xf32> -> vector<2x8x1xf32>
    %69 = vector.broadcast %68 : vector<2x8x1xf32> to vector<2x8x8xf32>
    %70 = arith.mulf %65, %69 : vector<2x8x8xf32>
    %71 = vector.shape_cast %70 : vector<2x8x8xf32> to vector<16x8xf32>
    %72 = vector.extract_strided_slice %27 {offsets = [0, 16], sizes = [16, 8], strides = [1, 1]} : vector<16x64xf32> to vector<16x8xf32>
    %73 = vector.shape_cast %72 : vector<16x8xf32> to vector<2x8x8xf32>
    %74 = vector.extract_strided_slice %27 {offsets = [0, 40], sizes = [16, 8], strides = [1, 1]} : vector<16x64xf32> to vector<16x8xf32>
    %75 = vector.shape_cast %74 : vector<16x8xf32> to vector<2x8x8xf32>
    %76 = vector.extract_strided_slice %27 {offsets = [0, 56], sizes = [16, 8], strides = [1, 1]} : vector<16x64xf32> to vector<16x8xf32>
    %77 = vector.shape_cast %76 : vector<16x8xf32> to vector<2x8x8xf32>
    "tpu.trace_start"() <{level = 10 : i32, message = "btd,bsd->bts"}> : () -> ()
    %cst_24 = arith.constant dense<0.000000e+00> : vector<2x8x8xf32>
    %78 = tpu.matmul %73, %75, %cst_24 {dimension_numbers = #tpu.dot_dimension_numbers<[2], [2], [1], [1], [0, 0, 0, 1, 1, 1], [0], [0]>} : vector<2x8x8xf32>, vector<2x8x8xf32>, vector<2x8x8xf32> -> vector<2x8x8xf32>
    "tpu.trace_stop"() : () -> ()
    %79 = vector.shape_cast %2 : vector<8x8xf32> to vector<1x8x8xf32>
    %80 = vector.broadcast %79 : vector<1x8x8xf32> to vector<2x8x8xf32>
    %81 = arith.addf %78, %80 : vector<2x8x8xf32>
    %cst_25 = arith.constant dense<0xFF800000> : vector<2x8xf32>
    %82 = vector.multi_reduction <maximumf>, %81, %cst_25 [2] : vector<2x8x8xf32> to vector<2x8xf32>
    %83 = vector.shape_cast %82 : vector<2x8xf32> to vector<2x8x1xf32>
    %84 = vector.broadcast %83 : vector<2x8x1xf32> to vector<2x8x8xf32>
    %85 = arith.subf %81, %84 : vector<2x8x8xf32>
    %86 = math.exp %85 : vector<2x8x8xf32>
    "tpu.trace_start"() <{level = 10 : i32, message = "bts,bsd->btd"}> : () -> ()
    %cst_26 = arith.constant dense<0.000000e+00> : vector<2x8x8xf32>
    %87 = tpu.matmul %86, %77, %cst_26 {dimension_numbers = #tpu.dot_dimension_numbers<[2], [1], [1], [2], [0, 0, 0, 1, 1, 2], [0], [0]>} : vector<2x8x8xf32>, vector<2x8x8xf32>, vector<2x8x8xf32> -> vector<2x8x8xf32>
    "tpu.trace_stop"() : () -> ()
    %cst_27 = arith.constant dense<0.000000e+00> : vector<2x8xf32>
    %88 = vector.multi_reduction <add>, %86, %cst_27 [2] : vector<2x8x8xf32> to vector<2x8xf32>
    %89 = vector.shape_cast %88 : vector<2x8xf32> to vector<2x8x1xf32>
    %90 = tpu.reciprocal %89 : vector<2x8x1xf32> -> vector<2x8x1xf32>
    %91 = vector.broadcast %90 : vector<2x8x1xf32> to vector<2x8x8xf32>
    %92 = arith.mulf %87, %91 : vector<2x8x8xf32>
    %93 = vector.shape_cast %92 : vector<2x8x8xf32> to vector<16x8xf32>
    %94 = vector.extract_strided_slice %27 {offsets = [0, 24], sizes = [16, 8], strides = [1, 1]} : vector<16x64xf32> to vector<16x8xf32>
    %95 = vector.shape_cast %94 : vector<16x8xf32> to vector<2x8x8xf32>
    %96 = vector.extract_strided_slice %27 {offsets = [0, 40], sizes = [16, 8], strides = [1, 1]} : vector<16x64xf32> to vector<16x8xf32>
    %97 = vector.shape_cast %96 : vector<16x8xf32> to vector<2x8x8xf32>
    %98 = vector.extract_strided_slice %27 {offsets = [0, 56], sizes = [16, 8], strides = [1, 1]} : vector<16x64xf32> to vector<16x8xf32>
    %99 = vector.shape_cast %98 : vector<16x8xf32> to vector<2x8x8xf32>
    "tpu.trace_start"() <{level = 10 : i32, message = "btd,bsd->bts"}> : () -> ()
    %cst_28 = arith.constant dense<0.000000e+00> : vector<2x8x8xf32>
    %100 = tpu.matmul %95, %97, %cst_28 {dimension_numbers = #tpu.dot_dimension_numbers<[2], [2], [1], [1], [0, 0, 0, 1, 1, 1], [0], [0]>} : vector<2x8x8xf32>, vector<2x8x8xf32>, vector<2x8x8xf32> -> vector<2x8x8xf32>
    "tpu.trace_stop"() : () -> ()
    %101 = vector.shape_cast %2 : vector<8x8xf32> to vector<1x8x8xf32>
    %102 = vector.broadcast %101 : vector<1x8x8xf32> to vector<2x8x8xf32>
    %103 = arith.addf %100, %102 : vector<2x8x8xf32>
    %cst_29 = arith.constant dense<0xFF800000> : vector<2x8xf32>
    %104 = vector.multi_reduction <maximumf>, %103, %cst_29 [2] : vector<2x8x8xf32> to vector<2x8xf32>
    %105 = vector.shape_cast %104 : vector<2x8xf32> to vector<2x8x1xf32>
    %106 = vector.broadcast %105 : vector<2x8x1xf32> to vector<2x8x8xf32>
    %107 = arith.subf %103, %106 : vector<2x8x8xf32>
    %108 = math.exp %107 : vector<2x8x8xf32>
    "tpu.trace_start"() <{level = 10 : i32, message = "bts,bsd->btd"}> : () -> ()
    %cst_30 = arith.constant dense<0.000000e+00> : vector<2x8x8xf32>
    %109 = tpu.matmul %108, %99, %cst_30 {dimension_numbers = #tpu.dot_dimension_numbers<[2], [1], [1], [2], [0, 0, 0, 1, 1, 2], [0], [0]>} : vector<2x8x8xf32>, vector<2x8x8xf32>, vector<2x8x8xf32> -> vector<2x8x8xf32>
    "tpu.trace_stop"() : () -> ()
    %cst_31 = arith.constant dense<0.000000e+00> : vector<2x8xf32>
    %110 = vector.multi_reduction <add>, %108, %cst_31 [2] : vector<2x8x8xf32> to vector<2x8xf32>
    %111 = vector.shape_cast %110 : vector<2x8xf32> to vector<2x8x1xf32>
    %112 = tpu.reciprocal %111 : vector<2x8x1xf32> -> vector<2x8x1xf32>
    %113 = vector.broadcast %112 : vector<2x8x1xf32> to vector<2x8x8xf32>
    %114 = arith.mulf %109, %113 : vector<2x8x8xf32>
    %115 = vector.shape_cast %114 : vector<2x8x8xf32> to vector<16x8xf32>
    %116 = tpu.concatenate %49, %71, %93, %115 in 1 : vector<16x8xf32>, vector<16x8xf32>, vector<16x8xf32>, vector<16x8xf32> -> vector<16x32xf32>
    %cst_32 = arith.constant dense<0.000000e+00> : vector<16x32xf32>
    %117 = tpu.matmul %116, %7, %cst_32 {dimension_numbers = #tpu.dot_dimension_numbers<[1], [0], [0], [1], [0, 0, 1, 1], [], []>} : vector<16x32xf32>, vector<32x32xf32>, vector<16x32xf32> -> vector<16x32xf32>
    %118 = arith.addf %0, %117 : vector<16x32xf32>
    %119 = arith.mulf %118, %118 : vector<16x32xf32>
    %cst_33 = arith.constant dense<0.000000e+00> : vector<16xf32>
    %120 = vector.multi_reduction <add>, %119, %cst_33 [1] : vector<16x32xf32> to vector<16xf32>
    %121 = vector.shape_cast %120 : vector<16xf32> to vector<16x1xf32>
    %cst_34 = arith.constant 3.200000e+01 : f32
    %122 = vector.broadcast %cst_34 : f32 to vector<16x1xf32>
    %123 = arith.divf %121, %122 : vector<16x1xf32>
    %cst_35 = arith.constant 9.99999997E-7 : f32
    %124 = vector.broadcast %cst_35 : f32 to vector<16x1xf32>
    %125 = arith.addf %123, %124 : vector<16x1xf32>
    %126 = math.rsqrt %125 : vector<16x1xf32>
    %127 = vector.broadcast %126 : vector<16x1xf32> to vector<16x32xf32>
    %128 = arith.mulf %118, %127 : vector<16x32xf32>
    %129 = vector.broadcast %9 : vector<1x32xf32> to vector<16x32xf32>
    %130 = arith.mulf %128, %129 : vector<16x32xf32>
    %cst_36 = arith.constant dense<0.000000e+00> : vector<16x128xf32>
    %131 = tpu.matmul %130, %4, %cst_36 {dimension_numbers = #tpu.dot_dimension_numbers<[1], [0], [0], [1], [0, 0, 1, 1], [], []>} : vector<16x32xf32>, vector<32x128xf32>, vector<16x128xf32> -> vector<16x128xf32>
    %132 = vector.extract_strided_slice %131 {offsets = [0, 0], sizes = [16, 64], strides = [1, 1]} : vector<16x128xf32> to vector<16x64xf32>
    %133 = vector.extract_strided_slice %131 {offsets = [0, 64], sizes = [16, 64], strides = [1, 1]} : vector<16x128xf32> to vector<16x64xf32>
    %134 = arith.negf %132 : vector<16x64xf32>
    %135 = math.exp %134 : vector<16x64xf32>
    %cst_37 = arith.constant 1.000000e+00 : f32
    %136 = vector.broadcast %cst_37 : f32 to vector<16x64xf32>
    %137 = arith.addf %136, %135 : vector<16x64xf32>
    %138 = arith.divf %136, %137 : vector<16x64xf32>
    %139 = arith.mulf %132, %138 : vector<16x64xf32>
    %140 = arith.mulf %139, %133 : vector<16x64xf32>
    %cst_38 = arith.constant dense<0.000000e+00> : vector<16x32xf32>
    %141 = tpu.matmul %140, %6, %cst_38 {dimension_numbers = #tpu.dot_dimension_numbers<[1], [0], [0], [1], [0, 0, 1, 1], [], []>} : vector<16x64xf32>, vector<64x32xf32>, vector<16x32xf32> -> vector<16x32xf32>
    %142 = arith.addf %118, %141 : vector<16x32xf32>
    %143 = arith.mulf %142, %142 : vector<16x32xf32>
    %cst_39 = arith.constant dense<0.000000e+00> : vector<16xf32>
    %144 = vector.multi_reduction <add>, %143, %cst_39 [1] : vector<16x32xf32> to vector<16xf32>
    %145 = vector.shape_cast %144 : vector<16xf32> to vector<16x1xf32>
    %cst_40 = arith.constant 3.200000e+01 : f32
    %146 = vector.broadcast %cst_40 : f32 to vector<16x1xf32>
    %147 = arith.divf %145, %146 : vector<16x1xf32>
    %cst_41 = arith.constant 9.99999997E-7 : f32
    %148 = vector.broadcast %cst_41 : f32 to vector<16x1xf32>
    %149 = arith.addf %147, %148 : vector<16x1xf32>
    %150 = math.rsqrt %149 : vector<16x1xf32>
    %151 = vector.broadcast %150 : vector<16x1xf32> to vector<16x32xf32>
    %152 = arith.mulf %142, %151 : vector<16x32xf32>
    %153 = vector.broadcast %10 : vector<1x32xf32> to vector<16x32xf32>
    %154 = arith.mulf %152, %153 : vector<16x32xf32>
    %cst_42 = arith.constant dense<0.000000e+00> : vector<16x128xf32>
    %155 = tpu.matmul %154, %5, %cst_42 {dimension_numbers = #tpu.dot_dimension_numbers<[1], [0], [0], [1], [0, 0, 1, 1], [], []>} : vector<16x32xf32>, vector<32x128xf32>, vector<16x128xf32> -> vector<16x128xf32>
    %c0_43 = arith.constant 0 : index
    %c0_44 = arith.constant 0 : index
    %156 = vector.load %arg2[%c0_43, %c0_44] : memref<16x128xf32, #tpu.memory_space<vmem>>, vector<16x128xf32>
    tpu.vector_store %arg2[%c0_43, %c0_44], %155 {strides = array<i32>} : memref<16x128xf32, #tpu.memory_space<vmem>>, vector<16x128xf32>,
    return
  }
}

</mosaic_0001>

<bundles_post_ra>
// kernel: tile.29
= control target key start
LH: loop header
LB: loop body
LE: loop exit
PB: predicated region body
PF: predicated region fallthrough
CT: control target
= control target key end

     0   :  { %vm36_vm0 = vcmask 1047556   ;;  %s81_s22 = smov 8   ;;  %s82_s23 = smov 16   ;;  %vm38_vm1 = vcmask 64512   ;;  %vm48_vm2 = vcmask 261312   ;;  %vm58_vm3 = vcmask 195712   ;;  %s133_s0 = inlined_call_operand.vmem [shape: f32[8,4,8], index: 0, kind: input, shape index: {}]   ;;  %s134_s1 = inlined_call_operand.vmem [shape: f32[8,32], index: 1, kind: output, shape index: {}]  }
   0x1   :  { %v70_v0 = vld [vmem:[%s133_s0 + $0x1c] sm:$0xf]  ;;  %v71_v1 = vld [vmem:[%s133_s0 + $0x18] sm:$0xf]  ;;  %v72_v2 = vld [vmem:[%s133_s0 + $0x14] sm:$0xf] }
   0x2   :  { %7 = vst [vmem:[#allocation0 + $0x38] sm:$0xf] %v70_v0  ;;  %v73_v3 = vld [vmem:[%s133_s0 + $0x10] sm:$0xf]  ;;  %v74_v4 = vld [vmem:[%s133_s0 + $0xc] sm:$0xf] }
   0x3   :  { %11 = vst [vmem:[#allocation0 + $0x30] sm:$0xf] %v71_v1  ;;  %v75_v5 = vld [vmem:[%s133_s0 + $0x8] sm:$0xf]  ;;  %v76_v6 = vld [vmem:[%s133_s0 + $0x4] sm:$0xf] }
   0x4   :  { %15 = vst [vmem:[#allocation0 + $0x28] sm:$0xf] %v72_v2  ;;  %v32_v7 = vld [vmem:[%s133_s0] sm:$0xf]  ;;  %s80_s0 = smov 24   ;;  %vm68_vm4 = vcmask 130112  }
   0x5   :  { %19 = vst [vmem:[#allocation0 + $0x20] sm:$0xf] %v73_v3 }
   0x6   :  { %23 = vst [vmem:[#allocation0 + $0x18] sm:$0xf] %v74_v4 }
   0x7   :  { %27 = vst [vmem:[#allocation0 + $0x10] sm:$0xf] %v75_v5 }
   0x8   :  { %31 = vst [vmem:[#allocation0 + $0x8] sm:$0xf] %v76_v6 }
   0x9   :  { %33 = vst [vmem:[#allocation0] sm:$0xf] %v32_v7 }
   0xc   :  { %v43_v8 = vld [vmem:[#allocation0 + $0x3] ss:$8 sm:$0xf0]   ;;  %v63_v9 = vld [vmem:[#allocation0 + $0x1] ss:$8 sm:$0xf0]  }
   0xd   :  { %v53_v15 = vld [vmem:[#allocation0 + $0x2] ss:$8 sm:$0xf0]   ;;  %v35_v18 = vld [vmem:[#allocation0] ss:$8 sm:$0xf0]  }
  0x10   :  { %v41_v10 = vld [vmem:[#allocation0 + $0x3] ss:$8 sm:$0xf]   ;;  %v61_v12 = vld [vmem:[#allocation0 + $0x1] ss:$8 sm:$0xf]  }
  0x11   :  { %v45_v11 = vsel %vm36_vm0, %v43_v8, %v41_v10  ;;  %v65_v13 = vsel %vm36_vm0, %v63_v9, %v61_v12  ;;  %v51_v14 = vld [vmem:[#allocation0 + $0x2] ss:$8 sm:$0xf]   ;;  %v34_v17 = vld [vmem:[#allocation0] ss:$8 sm:$0xf]  }
  0x12   :  { %46 = vrot.lane.b32.xlu0 %v45_v11, %s80_s0  ;;  %66 = vrot.lane.b32.xlu1 %v65_v13, %s81_s22  ;;  %v55_v16 = vsel %vm36_vm0, %v53_v15, %v51_v14  ;;  %v37_v19 = vsel %vm36_vm0, %v35_v18, %v34_v17 }
  0x13   :  { %39 = vst.msk [vmem:[%s134_s1] sm:$0xff] %vm38_vm1, %v37_v19  }
  0x1a   :  { %56 = vrot.lane.b32.xlu0 %v55_v16, %s82_s23 }
  0x84   :  { %v47_v20 = vpop.permute.xlu0 %46   ;;  %v67_v21 = vpop.permute.xlu1 %66  }
  0x85   :  { %49 = vst.msk [vmem:[%s134_s1] sm:$0xff] %vm48_vm2, %v47_v20  }
  0x8c   :  { %v57_v22 = vpop.permute.xlu0 %56  }
  0x8d   :  { %59 = vst.msk [vmem:[%s134_s1] sm:$0xff] %vm58_vm3, %v57_v22  }
  0x8e   :  { %69 = vst.msk [vmem:[%s134_s1] sm:$0xff] %vm68_vm4, %v67_v21  }

// kernel: tile.34
= control target key start
LH: loop header
LB: loop body
LE: loop exit
PB: predicated region body
PF: predicated region fallthrough
CT: control target
= control target key end

     0   :  { %vm36_vm0 = vcmask 1047556   ;;  %vm38_vm1 = vcmask 64512   ;;  %vm48_vm2 = vcmask 130112   ;;  %s99_s0 = inlined_call_operand.vmem [shape: f32[8,2,8], index: 0, kind: input, shape index: {}]   ;;  %s100_s1 = inlined_call_operand.vmem [shape: f32[8,16], index: 1, kind: output, shape index: {}]  }
   0x1   :  { %v50_v0 = vld [vmem:[%s99_s0 + $0xe] sm:$0x3]  ;;  %v51_v1 = vld [vmem:[%s99_s0 + $0xc] sm:$0x3]  ;;  %v52_v2 = vld [vmem:[%s99_s0 + $0xa] sm:$0x3] }
   0x2   :  { %7 = vst [vmem:[#allocation0 + $0x38] sm:$0x3] %v50_v0  ;;  %v53_v3 = vld [vmem:[%s99_s0 + $0x8] sm:$0x3]  ;;  %v54_v4 = vld [vmem:[%s99_s0 + $0x6] sm:$0x3] }
   0x3   :  { %11 = vst [vmem:[#allocation0 + $0x30] sm:$0x3] %v51_v1  ;;  %v55_v5 = vld [vmem:[%s99_s0 + $0x4] sm:$0x3]  ;;  %v56_v6 = vld [vmem:[%s99_s0 + $0x2] sm:$0x3] }
   0x4   :  { %15 = vst [vmem:[#allocation0 + $0x28] sm:$0x3] %v52_v2  ;;  %v32_v7 = vld [vmem:[%s99_s0] sm:$0x3]  ;;  %s58_s0 = smov 8  }
   0x5   :  { %19 = vst [vmem:[#allocation0 + $0x20] sm:$0x3] %v53_v3 }
   0x6   :  { %23 = vst [vmem:[#allocation0 + $0x18] sm:$0x3] %v54_v4 }
   0x7   :  { %27 = vst [vmem:[#allocation0 + $0x10] sm:$0x3] %v55_v5 }
   0x8   :  { %31 = vst [vmem:[#allocation0 + $0x8] sm:$0x3] %v56_v6 }
   0x9   :  { %33 = vst [vmem:[#allocation0] sm:$0x3] %v32_v7 }
   0xc   :  { %v35_v8 = vld [vmem:[#allocation0] ss:$8 sm:$0xf0]   ;;  %v43_v9 = vld [vmem:[#allocation0 + $0x1] ss:$8 sm:$0xf0]  }
  0x10   :  { %v34_v10 = vld [vmem:[#allocation0] ss:$8 sm:$0xf]   ;;  %v41_v11 = vld [vmem:[#allocation0 + $0x1] ss:$8 sm:$0xf]  }
  0x11   :  { %v37_v12 = vsel %vm36_vm0, %v35_v8, %v34_v10  ;;  %v45_v13 = vsel %vm36_vm0, %v43_v9, %v41_v11 }
  0x12   :  { %46 = vrot.lane.b32.xlu0 %v45_v13, %s58_s0  ;;  %39 = vst.msk [vmem:[%s100_s1] sm:$0xff] %vm38_vm1, %v37_v12  }
  0x84   :  { %v47_v14 = vpop.permute.xlu0 %46  }
  0x85   :  { %49 = vst.msk [vmem:[%s100_s1] sm:$0xff] %vm48_vm2, %v47_v14  }

// kernel: neg.1
= control target key start
LH: loop header
LB: loop body
LE: loop exit
PB: predicated region body
PF: predicated region fallthrough
CT: control target
= control target key end

     0   :  { %s24_s0 = inlined_call_operand.vmem [shape: f32[8,4], index: 0, kind: input, shape index: {}]   ;;  %s25_s1 = inlined_call_operand.vmem [shape: f32[8,4], index: 1, kind: output, shape index: {}]  }
   0x1   :  { %v2_v0 = vld [vmem:[%s24_s0] sm:$0xff] }
   0x2   :  { %v5_v1 = vxor.u32 2147483648, %v2_v0 }
   0x4   :  { %7 = vst [vmem:[%s25_s1] sm:$0xff] %v5_v1 }

// kernel: toy_model_forward.1
= control target key start
LH: loop header
LB: loop body
LE: loop exit
PB: predicated region body
PF: predicated region fallthrough
CT: control target
= control target key end

     0   :  { %vm46_vm0 = vcmask 261120   ;;  %s1434_s0 = inlined_call_operand.vmem [shape: f32[40,128], index: 0, kind: input, shape index: {}]   ;;  %s1435_s1 = inlined_call_operand.vmem [shape: f32[200,128], index: 1, kind: input, shape index: {}]   ;;  %s1436_s2 = inlined_call_operand.hbm [shape: f32[16,128], index: 2, kind: output, shape index: {}]  }
   0x1   :  { %v1187_v0 = vld [vmem:[%s1434_s0] sm:$0xff] }
   0x2   :  { %v44_v1 = vmul.f32 %v1187_v0, %v1187_v0 }
   0x3   :  { %7 = vsyncpa [#allocation3], 0  ;;  %v1194_v2 = vld [vmem:[%s1434_s0 + $0x8] sm:$0xff]  ;;  %v1155_v6 = vmov 32.0   ;;  %v20_v10 = vld [vmem:[%s1435_s1 + $0x18] sm:$0xff]  ;;  %s1156_s25 = smov 64  }
   0x4   :  { %v47_v3 = vsel %vm46_vm0, %v44_v1, 0.0  ;;  %v45_v4 = vmul.f32 %v1194_v2, %v1194_v2  ;;  %1075 = vrcp.f32 %v1155_v6  ;;  %107 = vmatpush.msra.mxu0 %v20_v10  ;;  %v19_v11 = vld [vmem:[%s1435_s1 + $0x10] sm:$0xff]  ;;  %v18_v13 = vld [vmem:[%s1435_s1 + $0x8] sm:$0xff]  ;;  %v17_v14 = vld [vmem:[%s1435_s1] sm:$0xff]  ;;  %s1157_s28 = smov 96   ;;  %s1158_s29 = smov 120  }
   0x5   :  { %48 = vadd.xlane.f32.xlu0 %v47_v3  ;;  %v1072_v31 = vld [vmem:[%s1435_s1 + $0xc0] ss:$0 sm:$0xff]  ;;  %v14_v42 = vld [vmem:[%s1434_s0 + $0x10] sm:$0xff]  ;;  %v15_v45 = vld [vmem:[%s1434_s0 + $0x18] sm:$0xff]  ;;  %s1159_s30 = smov 80   ;;  %s1160_s3 = smov 104  }
   0x6   :  { %v50_v5 = vsel %vm46_vm0, %v45_v4, 0.0  ;;  %108 = vmatpush.msra.mxu0 %v19_v11  ;;  %s1161_s4 = smov 88   ;;  %s1162_s5 = smov 112   ;;  %vm133_vm8 = vcmask 64512   ;;  %v1261_v60 = vld [vmem:[%s1434_s0 + $0x20] sm:$0xff] }
   0x7   :  { %s1163_s0 = smov 72   ;;  %s1164_s8 = smov 8  }
   0x8   :  { %109 = vmatpush.msra.mxu0 %v18_v13  ;;  %s1165_s9 = smov 16   ;;  %s1166_s12 = smov 24  }
   0xa   :  { %v1076_v7 = vpop.eup %1075  ;;  %110 = vmatpush.msra.mxu0 %v17_v14 }
   0xb   :  { %v54_v8 = vmul.f32 32.0, %v1076_v7  ;;  %vm58_vm1 = vweird.f32 %v1076_v7 }
   0xd   :  { %51 = vadd.xlane.f32.xlu0 %v50_v5  ;;  %v55_v9 = vsub.f32 1.0, %v54_v8 }
   0xf   :  { %v56_v12 = vmul.f32 %v1076_v7, %v55_v9 }
  0x11   :  { %v57_v15 = vadd.f32 %v1076_v7, %v56_v12 }
  0x13   :  { %v1212_v16 = vsel %vm58_vm1, %v1076_v7, %v57_v15 }
  0x78   :  { %v49_v17 = vpop.xlane.xlu0 %48 }
  0x79   :  { %v60_v18 = vmul.f32 %v1212_v16, %v49_v17 }
  0x7b   :  { %v62_v19 = vadd.f32 1e-06, %v60_v18 }
  0x7d   :  { %1077 = vrsqrt.f32 %v62_v19  ;;  %vm70_vm3 = vweird.f32 %v62_v19 }
  0x80   :  { %v52_v20 = vpop.xlane.xlu0 %51 }
  0x81   :  { %v61_v21 = vmul.f32 %v1212_v16, %v52_v20 }
  0x83   :  { %v1078_v22 = vpop.eup %1077  ;;  %v63_v23 = vadd.f32 1e-06, %v61_v21 }
  0x84   :  { %v65_v24 = vmul.f32 %v1078_v22, %v62_v19  ;;  %vm71_vm2 = vweird.f32 %v1078_v22 }
  0x85   :  { %1079 = vrsqrt.f32 %v63_v23  ;;  %vm72_vm4 = vmor %vm70_vm3, %vm71_vm2  ;;  %vm80_vm5 = vweird.f32 %v63_v23 }
  0x86   :  { %v66_v25 = vmul.f32 %v1078_v22, %v65_v24 }
  0x88   :  { %v67_v26 = vmul.f32 0.5, %v66_v25 }
  0x8a   :  { %v68_v27 = vsub.f32 1.5, %v67_v26 }
  0x8b   :  { %v1080_v28 = vpop.eup %1079 }
  0x8c   :  { %v69_v29 = vmul.f32 %v1078_v22, %v68_v27  ;;  %v75_v30 = vmul.f32 %v1080_v28, %v63_v23  ;;  %vm81_vm6 = vweird.f32 %v1080_v28 }
  0x8d   :  { %vm82_vm7 = vmor %vm80_vm5, %vm81_vm6 }
  0x8e   :  { %v76_v32 = vmul.f32 %v1080_v28, %v75_v30  ;;  %v73_v33 = vsel %vm72_vm4, %v1078_v22, %v69_v29 }
  0x8f   :  { %v84_v34 = vmul.f32 %v73_v33, %v1187_v0 }
  0x90   :  { %v77_v35 = vmul.f32 0.5, %v76_v32 }
  0x91   :  { %v87_v36 = vmul.f32 %v1072_v31, %v84_v34 }
  0x92   :  { %v78_v37 = vsub.f32 1.5, %v77_v35 }
  0x93   :  { %1022 = vmatmul.msk.f32.vlgmr.msra.gmra.mxu0 %vm46_vm0, %v87_v36 }
  0x94   :  { %v79_v38 = vmul.f32 %v1080_v28, %v78_v37 }
  0x96   :  { %v83_v39 = vsel %vm82_vm7, %v1080_v28, %v79_v38 }
  0x97   :  { %v85_v40 = vmul.f32 %v83_v39, %v1194_v2 }
  0x99   :  { %v88_v41 = vmul.f32 %v1072_v31, %v85_v40 }
  0x9b   :  { %1023 = vmatmul.msk.f32.gmra.mxu0 %vm46_vm0, %v88_v41 }
 0x110   :  { %v112_v43 = vpop.f32.mrf.mxu0 }
 0x111   :  { %v118_v44 = vmul.f32 %v112_v43, %v14_v42 }
 0x113   :  { %122 = vrot.lane.b32.xlu1 %v118_v44, %s1156_s25 }
 0x118   :  { %v115_v46 = vpop.f32.mrf.mxu0 }
 0x119   :  { %v119_v47 = vmul.f32 %v115_v46, %v15_v45 }
 0x11b   :  { %124 = vrot.lane.b32.xlu2 %v119_v47, %s1156_s25 }
 0x175   :  { %v125_v48 = vpop.permute.xlu2 %124 }
 0x176   :  { %v1231_v49 = vadd.f32 %v125_v48, %v119_v47 }
 0x178   :  { %159 = vrot.lane.b32.xlu0 %v1231_v49, %s1157_s28 }
 0x185   :  { %v123_v50 = vpop.permute.xlu1 %122 }
 0x186   :  { %v1234_v51 = vadd.f32 %v123_v50, %v118_v44 }
 0x188   :  { %131 = vrot.lane.b32.xlu1 %v1234_v51, %s1157_s28  ;;  %285 = vrot.lane.b32.xlu0 %v1234_v51, %s1158_s29 }
 0x190   :  { %197 = vrot.lane.b32.xlu1 %v1234_v51, %s1159_s30  ;;  %583 = vrot.lane.b32.xlu0 %v1234_v51, %s1160_s3 }
 0x198   :  { %309 = vrot.lane.b32.xlu1 %v1231_v49, %s1158_s29  ;;  %607 = vrot.lane.b32.xlu0 %v1231_v49, %s1160_s3  ;;  %s1010_s29 = sshll.u32 %s1436_s2, 4  ;;  %s1011_s29 = int_to_ptr.hbm [resolvable:$true] %s1010_s29 }
 0x1a0   :  { %429 = vrot.lane.b32.xlu1 %v1234_v51, %s1161_s4 }
 0x1a8   :  { %427 = vrot.lane.b32.xlu1 %v1234_v51, %s1162_s5 }
 0x1b0   :  { %457 = vrot.lane.b32.xlu1 %v1231_v49, %s1161_s4  ;;  %s1168_s4 = smov 128  }
 0x1ea   :  { %v160_v52 = vpop.permute.xlu0 %159 }
 0x1eb   :  { %1026 = vmatpush.xpose.msk.msra.mxu2 %vm133_vm8, %v160_v52 }
 0x1ee   :  { %1027 = vmatmul.msk.f32.vlgmr.msra.gmra.mxu2 %vm133_vm8, %v1231_v49 }
 0x1fa   :  { %v132_v53 = vpop.permute.xlu1 %131  ;;  %v286_v55 = vpop.permute.xlu0 %285 }
 0x1fb   :  { %1024 = vmatpush.xpose.msk.msra.mxu1 %vm133_vm8, %v132_v53 }
 0x1fe   :  { %1025 = vmatmul.msk.f32.vlgmr.msra.gmra.mxu1 %vm133_vm8, %v1234_v51 }
 0x1ff   :  { %1030 = vmatpush.xpose.msk.msrb.mxu1 %vm133_vm8, %v132_v53 }
 0x202   :  { %v198_v54 = vpop.permute.xlu1 %197  ;;  %v584_v8 = vpop.permute.xlu0 %583 }
 0x203   :  { %218 = vmatpush.msrb.mxu2 %v198_v54 }
 0x205   :  { %1032 = vmatpush.xpose.msk.msra.mxu2 %vm133_vm8, %v160_v52 }
 0x206   :  { %1031 = vmatmul.msk.f32.vlgmr.msrb.gmra.mxu1 %vm133_vm8, %v286_v55 }
 0x20a   :  { %v310_v56 = vpop.permute.xlu1 %309  ;;  %v608_v9 = vpop.permute.xlu0 %607 }
 0x212   :  { %v430_v57 = vpop.permute.xlu1 %429 }
 0x21a   :  { %v428_v58 = vpop.permute.xlu1 %427 }
 0x222   :  { %v458_v59 = vpop.permute.xlu1 %457 }
 0x223   :  { %1038 = vmatpush.xpose.msk.msrb.mxu0 %vm133_vm8, %v458_v59 }
 0x227   :  { %1044 = vmatpush.xpose.msk.msra.mxu0 %vm133_vm8, %v458_v59 }
 0x271   :  { %v182_v61 = vpop.f32.mrf.mxu2 }
 0x272   :  { %v183_v62 = vadd.f32 %v182_v61, %v1261_v60 }
 0x274   :  { %v188_v63 = vsel %vm133_vm8, %v183_v62, -inf }
 0x275   :  { %189 = vmax.xlane.f32.xlu1 %v188_v63 }
 0x27b   :  { %v155_v1 = vpop.f32.mrf.mxu1 }
 0x27c   :  { %v156_v3 = vadd.f32 %v155_v1, %v1261_v60 }
 0x27e   :  { %v185_v4 = vsel %vm133_vm8, %v156_v3, -inf }
 0x27f   :  { %186 = vmax.xlane.f32.xlu2 %v185_v4 }
 0x283   :  { %v306_v5 = vpop.f32.mrf.mxu1 }
 0x284   :  { %v307_v6 = vadd.f32 %v306_v5, %v1261_v60 }
 0x286   :  { %v333_v7 = vsel %vm133_vm8, %v307_v6, -inf }
 0x287   :  { %334 = vmax.xlane.f32.xlu0 %v333_v7 }
 0x297   :  { %455 = vrot.lane.b32.xlu2 %v1231_v49, %s1162_s5 }
 0x29f   :  { %223 = vrot.lane.b32.xlu2 %v1231_v49, %s1159_s30  ;;  %s1167_s30 = smov [#allocation2]  }
 0x2a0   :  { %s1008_s3 = sshll.u32 %s1167_s30, 4  ;;  %s1009_s3 = int_to_ptr.vmem [resolvable:$true] %s1008_s3 }
 0x2e8   :  { %v190_v10 = vpop.xlane.xlu1 %189 }
 0x2e9   :  { %v192_v13 = vsub.f32 %v183_v62, %v190_v10 }
 0x2eb   :  { %v195_v15 = vmul.f32 1.442695, %v192_v13 }
 0x2f2   :  { %v187_v11 = vpop.xlane.xlu2 %186 }
 0x2f3   :  { %v191_v12 = vsub.f32 %v156_v3, %v187_v11 }
 0x2f5   :  { %v193_v14 = vmul.f32 1.442695, %v191_v12 }
 0x2f7   :  { %1081 = vpow2.f32 %v193_v14 }
 0x2f8   :  { %1083 = vpow2.f32 %v195_v15 }
 0x2fa   :  { %v335_v17 = vpop.xlane.xlu0 %334  ;;  %v456_v18 = vpop.permute.xlu2 %455 }
 0x2fb   :  { %1039 = vmatmul.msk.f32.vlgmr.msrb.gmra.mxu0 %vm133_vm8, %v456_v18  ;;  %v339_v20 = vsub.f32 %v307_v6, %v335_v17 }
 0x2fd   :  { %v1274_v19 = vpop.eup %1081  ;;  %v341_v21 = vmul.f32 1.442695, %v339_v20 }
 0x2fe   :  { %1028 = vmatmul.msk.f32.vlgmr.msrb.gmra.mxu2 %vm133_vm8, %v1274_v19  ;;  %v1279_v23 = vpop.eup %1083 }
 0x2ff   :  { %1036 = vmatpush.xpose.msk.msrb.mxu2 %vm133_vm8, %v430_v57  ;;  %1085 = vpow2.f32 %v341_v21 }
 0x302   :  { %v224_v22 = vpop.permute.xlu2 %223 }
 0x303   :  { %244 = vmatpush.msra.mxu3 %v224_v22  ;;  %386 = vmatpush.msra.mxu1 %v224_v22 }
 0x304   :  { %1045 = vmatmul.msk.f32.vlgmr.msra.gmra.mxu0 %vm133_vm8, %v608_v9  ;;  %1029 = vmatmul.msk.f32.vlgmr.msra.gmra.mxu3 %vm133_vm8, %v1279_v23 }
 0x305   :  { %363 = vmatpush.msrb.mxu3 %v198_v54  ;;  %v1086_v24 = vpop.eup %1085 }
 0x306   :  { %1033 = vmatmul.msk.f32.vlgmr.msra.gmra.mxu2 %vm133_vm8, %v310_v56  ;;  %v391_v41 = vsel %vm133_vm8, %v1086_v24, 0.0 }
 0x307   :  { %1042 = vmatpush.xpose.msk.msra.mxu2 %vm133_vm8, %v430_v57 }
 0x30c   :  { %1034 = vmatmul.msk.f32.vlgmr.msrb.gmra.mxu3 %vm133_vm8, %v1086_v24  ;;  %v249_v24 = vsel %vm133_vm8, %v1274_v19, 0.0 }
 0x30e   :  { %1037 = vmatmul.msk.f32.vlgmr.msrb.gmra.mxu2 %vm133_vm8, %v428_v58 }
 0x316   :  { %1043 = vmatmul.msk.f32.vlgmr.msra.gmra.mxu2 %vm133_vm8, %v584_v8 }
 0x378   :  { %v480_v34 = vpop.f32.mrf.mxu0 }
 0x379   :  { %v481_v36 = vadd.f32 %v480_v34, %v1261_v60 }
 0x37b   :  { %v486_v37 = vsel %vm133_vm8, %v481_v36, -inf }
 0x381   :  { %v1289_v25 = vpop.f32.mrf.mxu2  ;;  %v628_v38 = vpop.f32.mrf.mxu0 }
 0x382   :  { %v629_v39 = vadd.f32 %v628_v38, %v1261_v60 }
 0x384   :  { %v634_v40 = vsel %vm133_vm8, %v629_v39, -inf }
 0x387   :  { %v1313_v8 = vpop.f32.mrf.mxu3 }
 0x389   :  { %v330_v26 = vpop.f32.mrf.mxu2 }
 0x38a   :  { %v331_v27 = vadd.f32 %v330_v26, %v1261_v60  ;;  %v252_v26 = vsel %vm133_vm8, %v1279_v23, 0.0 }
 0x38c   :  { %v336_v28 = vsel %vm133_vm8, %v331_v27, -inf }
 0x38d   :  { %337 = vmax.xlane.f32.xlu1 %v336_v28 }
 0x38f   :  { %v365_v20 = vpop.f32.mrf.mxu3 }
 0x391   :  { %v452_v29 = vpop.f32.mrf.mxu2 }
 0x392   :  { %v453_v30 = vadd.f32 %v452_v29, %v1261_v60 }
 0x394   :  { %v483_v31 = vsel %vm133_vm8, %v453_v30, -inf }
 0x395   :  { %484 = vmax.xlane.f32.xlu2 %v483_v31 }
 0x399   :  { %v604_v32 = vpop.f32.mrf.mxu2 }
 0x39a   :  { %v605_v33 = vadd.f32 %v604_v32, %v1261_v60 }
 0x39c   :  { %v631_v35 = vsel %vm133_vm8, %v605_v33, -inf }
 0x39d   :  { %632 = vmax.xlane.f32.xlu0 %v631_v35 }
 0x3a5   :  { %487 = vmax.xlane.f32.xlu0 %v486_v37 }
 0x3a6   :  { %495 = vrot.lane.b32.xlu1 %v1234_v51, %s1163_s0 }
 0x3ad   :  { %521 = vrot.lane.b32.xlu2 %v1231_v49, %s1163_s0  ;;  %635 = vmax.xlane.f32.xlu0 %v634_v40 }
 0x3b5   :  { %392 = vadd.xlane.f32.xlu0 %v391_v41 }
 0x400   :  { %v338_v42 = vpop.xlane.xlu1 %337 }
 0x401   :  { %v340_v43 = vsub.f32 %v331_v27, %v338_v42 }
 0x403   :  { %v343_v44 = vmul.f32 1.442695, %v340_v43 }
 0x405   :  { %1087 = vpow2.f32 %v343_v44 }
 0x408   :  { %v485_v45 = vpop.xlane.xlu2 %484 }
 0x409   :  { %v489_v46 = vsub.f32 %v453_v30, %v485_v45 }
 0x40b   :  { %v1088_v47 = vpop.eup %1087  ;;  %v491_v48 = vmul.f32 1.442695, %v489_v46 }
 0x40c   :  { %1035 = vmatmul.msk.f32.vlgmr.msra.gmra.mxu1 %vm133_vm8, %v1088_v47  ;;  %v394_v50 = vsel %vm133_vm8, %v1088_v47, 0.0 }
 0x40d   :  { %1089 = vpow2.f32 %v491_v48  ;;  %395 = vadd.xlane.f32.xlu0 %v394_v50 }
 0x410   :  { %v633_v51 = vpop.xlane.xlu0 %632  ;;  %v522_v49 = vpop.permute.xlu2 %521 }
 0x411   :  { %542 = vmatpush.msrb.mxu1 %v522_v49  ;;  %v637_v53 = vsub.f32 %v605_v33, %v633_v51 }
 0x413   :  { %684 = vmatpush.msra.mxu1 %v522_v49  ;;  %v1090_v52 = vpop.eup %1089  ;;  %v639_v55 = vmul.f32 1.442695, %v637_v53 }
 0x414   :  { %v547_v54 = vsel %vm133_vm8, %v1090_v52, 0.0 }
 0x415   :  { %548 = vadd.xlane.f32.xlu1 %v547_v54  ;;  %1091 = vpow2.f32 %v639_v55 }
 0x418   :  { %v496_v56 = vpop.permute.xlu1 %495  ;;  %v488_v57 = vpop.xlane.xlu0 %487 }
 0x419   :  { %v490_v58 = vsub.f32 %v481_v36, %v488_v57  ;;  %516 = vmatpush.msra.mxu3 %v496_v56 }
 0x41a   :  { %1040 = vmatmul.msk.f32.vlgmr.msra.gmra.mxu3 %vm133_vm8, %v1090_v52 }
 0x41b   :  { %v493_v59 = vmul.f32 1.442695, %v490_v58  ;;  %661 = vmatpush.msrb.mxu3 %v496_v56  ;;  %v1092_v61 = vpop.eup %1091 }
 0x41c   :  { %v689_v13 = vsel %vm133_vm8, %v1092_v61, 0.0 }
 0x41d   :  { %1093 = vpow2.f32 %v493_v59 }
 0x420   :  { %v636_v60 = vpop.xlane.xlu0 %635 }
 0x421   :  { %v638_v62 = vsub.f32 %v629_v39, %v636_v60  ;;  %v40_v60 = vld [vmem:[%s1435_s1 + $0xb8] sm:$0xff] }
 0x422   :  { %1046 = vmatmul.msk.f32.vlgmr.msrb.gmra.mxu3 %vm133_vm8, %v1092_v61  ;;  %775 = vmatpush.msrb.mxu2 %v40_v60 }
 0x423   :  { %v1094_v63 = vpop.eup %1093  ;;  %v641_v1 = vmul.f32 1.442695, %v638_v62 }
 0x424   :  { %1041 = vmatmul.msk.f32.vlgmr.msrb.gmra.mxu1 %vm133_vm8, %v1094_v63  ;;  %v550_v3 = vsel %vm133_vm8, %v1094_v63, 0.0 }
 0x425   :  { %1095 = vpow2.f32 %v641_v1  ;;  %551 = vadd.xlane.f32.xlu2 %v550_v3 }
 0x428   :  { %v393_v4 = vpop.xlane.xlu0 %392 }
 0x429   :  { %1097 = vrcp.f32 %v393_v4  ;;  %v408_v11 = vand.u32 2147483648, %v393_v4  ;;  %v406_v14 = vand.u32 2147483647, %v393_v4  ;;  %vm402_vm10 = vweird.f32 %v393_v4 }
 0x42b   :  { %v1096_v5 = vpop.eup %1095  ;;  %v409_v17 = vor.u32 1.1754944e-38, %v408_v11  ;;  %vm407_vm12 = vcmp.eq.f32.partialorder %v406_v14, 8.507059e+37 }
 0x42c   :  { %1047 = vmatmul.msk.f32.vlgmr.msra.gmra.mxu1 %vm133_vm8, %v1096_v5  ;;  %v692_v6 = vsel %vm133_vm8, %v1096_v5, 0.0 }
 0x42d   :  { %693 = vadd.xlane.f32.xlu0 %v692_v6 }
 0x42f   :  { %v1098_v7 = vpop.eup %1097 }
 0x430   :  { %v398_v9 = vmul.f32 %v1098_v7, %v393_v4  ;;  %vm403_vm9 = vweird.f32 %v1098_v7 }
 0x431   :  { %vm404_vm11 = vmor %vm402_vm10, %vm403_vm9 }
 0x432   :  { %v399_v10 = vsub.f32 1.0, %v398_v9 }
 0x434   :  { %v400_v12 = vmul.f32 %v1098_v7, %v399_v10 }
 0x435   :  { %690 = vadd.xlane.f32.xlu0 %v689_v13 }
 0x436   :  { %v401_v15 = vadd.f32 %v1098_v7, %v400_v12 }
 0x438   :  { %v405_v18 = vsel %vm404_vm11, %v1098_v7, %v401_v15 }
 0x439   :  { %v410_v21 = vsel %vm407_vm12, %v409_v17, %v405_v18 }
 0x43a   :  { %v425_v22 = vmul.f32 %v410_v21, %v365_v20 }
 0x43c   :  { %727 = vrot.lane.b32.xlu1 %v425_v22, %s1164_s8 }
 0x43d   :  { %250 = vadd.xlane.f32.xlu0 %v249_v24 }
 0x445   :  { %253 = vadd.xlane.f32.xlu0 %v252_v26 }
 0x480   :  { %v396_v27 = vpop.xlane.xlu0 %395 }
 0x481   :  { %1099 = vrcp.f32 %v396_v27  ;;  %v422_v42 = vand.u32 2147483648, %v396_v27  ;;  %vm416_vm3 = vweird.f32 %v396_v27  ;;  %v420_v45 = vand.u32 2147483647, %v396_v27 }
 0x483   :  { %v423_v52 = vor.u32 1.1754944e-38, %v422_v42  ;;  %vm421_vm5 = vcmp.eq.f32.partialorder %v420_v45, 8.507059e+37 }
 0x487   :  { %v1100_v29 = vpop.eup %1099 }
 0x488   :  { %v549_v28 = vpop.xlane.xlu1 %548  ;;  %v412_v31 = vmul.f32 %v1100_v29, %v396_v27  ;;  %vm417_vm1 = vweird.f32 %v1100_v29 }
 0x489   :  { %1101 = vrcp.f32 %v549_v28  ;;  %v564_v37 = vand.u32 2147483648, %v549_v28  ;;  %vm558_vm14 = vweird.f32 %v549_v28  ;;  %v562_v39 = vand.u32 2147483647, %v549_v28  ;;  %v388_v48 = vpop.f32.mrf.mxu1  ;;  %vm418_vm4 = vmor %vm416_vm3, %vm417_vm1 }
 0x48a   :  { %v413_v34 = vsub.f32 1.0, %v412_v31 }
 0x48b   :  { %v565_v40 = vor.u32 1.1754944e-38, %v564_v37  ;;  %vm563_vm2 = vcmp.eq.f32.partialorder %v562_v39, 8.507059e+37  ;;  %v37_v37 = vld [vmem:[%s1435_s1 + $0xa0] sm:$0xff] }
 0x48c   :  { %v414_v19 = vmul.f32 %v1100_v29, %v413_v34 }
 0x48e   :  { %v415_v41 = vadd.f32 %v1100_v29, %v414_v19 }
 0x48f   :  { %v1102_v30 = vpop.eup %1101 }
 0x490   :  { %v554_v32 = vmul.f32 %v1102_v30, %v549_v28  ;;  %vm559_vm13 = vweird.f32 %v1102_v30  ;;  %v419_v50 = vsel %vm418_vm4, %v1100_v29, %v415_v41 }
 0x491   :  { %vm560_vm15 = vmor %vm558_vm14, %vm559_vm13  ;;  %v424_v54 = vsel %vm421_vm5, %v423_v52, %v419_v50 }
 0x492   :  { %v555_v33 = vsub.f32 1.0, %v554_v32  ;;  %v426_v58 = vmul.f32 %v424_v54, %v388_v48 }
 0x494   :  { %v556_v35 = vmul.f32 %v1102_v30, %v555_v33 }
 0x496   :  { %v557_v36 = vadd.f32 %v1102_v30, %v556_v35  ;;  %v39_v35 = vld [vmem:[%s1435_s1 + $0xb0] sm:$0xff] }
 0x497   :  { %776 = vmatpush.msrb.mxu2 %v39_v35 }
 0x498   :  { %v552_v38 = vpop.xlane.xlu2 %551  ;;  %v561_v23 = vsel %vm560_vm15, %v1102_v30, %v557_v36  ;;  %v38_v36 = vld [vmem:[%s1435_s1 + $0xa8] sm:$0xff] }
 0x499   :  { %1103 = vrcp.f32 %v552_v38  ;;  %v566_v44 = vsel %vm563_vm2, %v565_v40, %v561_v23  ;;  %v578_v55 = vand.u32 2147483648, %v552_v38  ;;  %v576_v57 = vand.u32 2147483647, %v552_v38  ;;  %777 = vmatpush.msrb.mxu2 %v38_v36 }
 0x49a   :  { %vm572_vm7 = vweird.f32 %v552_v38 }
 0x49b   :  { %v579_v63 = vor.u32 1.1754944e-38, %v578_v55  ;;  %vm577_vm10 = vcmp.eq.f32.partialorder %v576_v57, 8.507059e+37  ;;  %778 = vmatpush.msrb.mxu2 %v37_v37 }
 0x49d   :  { %v518_v43 = vpop.f32.mrf.mxu3 }
 0x49e   :  { %v581_v46 = vmul.f32 %v566_v44, %v518_v43 }
 0x49f   :  { %v1104_v47 = vpop.eup %1103 }
 0x4a0   :  { %v568_v51 = vmul.f32 %v1104_v47, %v552_v38  ;;  %v694_v49 = vpop.xlane.xlu0 %693  ;;  %735 = vrot.lane.b32.xlu0 %v581_v46, %s1165_s9  ;;  %vm573_vm6 = vweird.f32 %v1104_v47 }
 0x4a1   :  { %1105 = vrcp.f32 %v694_v49  ;;  %v544_v62 = vpop.f32.mrf.mxu1  ;;  %vm574_vm9 = vmor %vm572_vm7, %vm573_vm6  ;;  %v720_v9 = vand.u32 2147483648, %v694_v49  ;;  %v718_v11 = vand.u32 2147483647, %v694_v49  ;;  %vm714_vm12 = vweird.f32 %v694_v49 }
 0x4a2   :  { %v569_v53 = vsub.f32 1.0, %v568_v51 }
 0x4a3   :  { %v721_v14 = vor.u32 1.1754944e-38, %v720_v9  ;;  %vm719_vm14 = vcmp.eq.f32.partialorder %v718_v11, 8.507059e+37 }
 0x4a4   :  { %v570_v56 = vmul.f32 %v1104_v47, %v569_v53 }
 0x4a5   :  { %v663_v31 = vpop.f32.mrf.mxu3 }
 0x4a6   :  { %v571_v59 = vadd.f32 %v1104_v47, %v570_v56 }
 0x4a7   :  { %v1106_v61 = vpop.eup %1105 }
 0x4a8   :  { %v710_v1 = vmul.f32 %v1106_v61, %v694_v49  ;;  %v575_v3 = vsel %vm574_vm9, %v1104_v47, %v571_v59  ;;  %v691_v4 = vpop.xlane.xlu0 %690  ;;  %729 = vrot.lane.b32.xlu0 %v426_v58, %s1164_s8  ;;  %vm715_vm11 = vweird.f32 %v1106_v61  ;;  %vm751_vm9 = vcmask 130048  }
 0x4a9   :  { %v580_v5 = vsel %vm577_vm10, %v579_v63, %v575_v3  ;;  %1107 = vrcp.f32 %v691_v4  ;;  %vm716_vm13 = vmor %vm714_vm12, %vm715_vm11  ;;  %v686_v18 = vpop.f32.mrf.mxu1  ;;  %v706_v26 = vand.u32 2147483648, %v691_v4  ;;  %v704_v27 = vand.u32 2147483647, %v691_v4 }
 0x4aa   :  { %v711_v6 = vsub.f32 1.0, %v710_v1  ;;  %v582_v7 = vmul.f32 %v580_v5, %v544_v62  ;;  %vm700_vm1 = vweird.f32 %v691_v4  ;;  %vm754_vm10 = vcmask 195584  }
 0x4ab   :  { %v707_v29 = vor.u32 1.1754944e-38, %v706_v26  ;;  %vm705_vm3 = vcmp.eq.f32.partialorder %v704_v27, 8.507059e+37 }
 0x4ac   :  { %v712_v10 = vmul.f32 %v1106_v61, %v711_v6  ;;  %737 = vrot.lane.b32.xlu1 %v582_v7, %s1165_s9 }
 0x4ae   :  { %v713_v12 = vadd.f32 %v1106_v61, %v712_v10  ;;  %v728_v52 = vpop.permute.xlu1 %727 }
 0x4af   :  { %v1108_v13 = vpop.eup %1107 }
 0x4b0   :  { %v696_v15 = vmul.f32 %v1108_v13, %v691_v4  ;;  %v717_v17 = vsel %vm716_vm13, %v1106_v61, %v713_v12  ;;  %vm701_vm15 = vweird.f32 %v1108_v13  ;;  %v251_v34 = vpop.xlane.xlu0 %250 }
 0x4b1   :  { %v722_v20 = vsel %vm719_vm14, %v721_v14, %v717_v17  ;;  %vm702_vm2 = vmor %vm700_vm1, %vm701_vm15  ;;  %1109 = vrcp.f32 %v251_v34  ;;  %v266_v42 = vand.u32 2147483648, %v251_v34  ;;  %vm260_vm5 = vweird.f32 %v251_v34  ;;  %v23_v17 = vld [vmem:[%s1435_s1 + $0x30] sm:$0xff] }
 0x4b2   :  { %v697_v21 = vsub.f32 1.0, %v696_v15  ;;  %v724_v22 = vmul.f32 %v722_v20, %v686_v18  ;;  %v264_v44 = vand.u32 2147483647, %v251_v34  ;;  %v21_v18 = vld [vmem:[%s1435_s1 + $0x20] sm:$0xff] }
 0x4b3   :  { %v267_v46 = vor.u32 1.1754944e-38, %v266_v42 }
 0x4b4   :  { %v698_v24 = vmul.f32 %v1108_v13, %v697_v21  ;;  %745 = vrot.lane.b32.xlu0 %v724_v22, %s1166_s12  ;;  %vm265_vm7 = vcmp.eq.f32.partialorder %v264_v44, 8.507059e+37 }
 0x4b6   :  { %v699_v28 = vadd.f32 %v1108_v13, %v698_v24 }
 0x4b7   :  { %v1110_v19 = vpop.eup %1109 }
 0x4b8   :  { %v703_v30 = vsel %vm702_vm2, %v1108_v13, %v699_v28  ;;  %v256_v38 = vmul.f32 %v1110_v19, %v251_v34  ;;  %v254_v23 = vpop.xlane.xlu0 %253  ;;  %vm261_vm4 = vweird.f32 %v1110_v19  ;;  %v1073_v34 = vld [vmem:[%s1435_s1 + $0xc1] ss:$0 sm:$0xff] }
 0x4b9   :  { %v708_v32 = vsel %vm705_vm3, %v707_v29, %v703_v30  ;;  %1111 = vrcp.f32 %v254_v23  ;;  %vm262_vm6 = vmor %vm260_vm5, %vm261_vm4  ;;  %v280_v59 = vand.u32 2147483648, %v254_v23  ;;  %vm274_vm12 = vweird.f32 %v254_v23 }
 0x4ba   :  { %v723_v33 = vmul.f32 %v708_v32, %v663_v31  ;;  %v257_v39 = vsub.f32 1.0, %v256_v38  ;;  %v278_v60 = vand.u32 2147483647, %v254_v23 }
 0x4bb   :  { %v281_v61 = vor.u32 1.1754944e-38, %v280_v59 }
 0x4bc   :  { %743 = vrot.lane.b32.xlu2 %v723_v33, %s1166_s12  ;;  %v258_v40 = vmul.f32 %v1110_v19, %v257_v39  ;;  %vm279_vm14 = vcmp.eq.f32.partialorder %v278_v60, 8.507059e+37 }
 0x4be   :  { %v259_v41 = vadd.f32 %v1110_v19, %v258_v40 }
 0x4bf   :  { %v1112_v43 = vpop.eup %1111 }
 0x4c0   :  { %v263_v45 = vsel %vm262_vm6, %v1110_v19, %v259_v41  ;;  %v270_v47 = vmul.f32 %v1112_v43, %v254_v23  ;;  %vm275_vm11 = vweird.f32 %v1112_v43 }
 0x4c1   :  { %v268_v48 = vsel %vm265_vm7, %v267_v46, %v263_v45  ;;  %vm276_vm13 = vmor %vm274_vm12, %vm275_vm11  ;;  %v36_v46 = vld [vmem:[%s1435_s1 + $0x98] sm:$0xff] }
 0x4c2   :  { %v271_v50 = vsub.f32 1.0, %v270_v47  ;;  %v283_v51 = vmul.f32 %v268_v48, %v1289_v25  ;;  %v35_v47 = vld [vmem:[%s1435_s1 + $0x90] sm:$0xff]  ;;  %919 = vmatpush.msra.mxu3 %v36_v46  ;;  %v34_v48 = vld [vmem:[%s1435_s1 + $0x88] sm:$0xff] }
 0x4c4   :  { %v272_v53 = vmul.f32 %v1112_v43, %v271_v50  ;;  %v749_v54 = vsel %vm133_vm8, %v283_v51, %v728_v52  ;;  %920 = vmatpush.msra.mxu3 %v35_v47  ;;  %v33_v51 = vld [vmem:[%s1435_s1 + $0x80] sm:$0xff]  ;;  %v31_v52 = vld [vmem:[%s1435_s1 + $0x70] sm:$0xff] }
 0x4c6   :  { %v273_v58 = vadd.f32 %v1112_v43, %v272_v53  ;;  %921 = vmatpush.msra.mxu3 %v34_v48  ;;  %v30_v53 = vld [vmem:[%s1435_s1 + $0x68] sm:$0xff]  ;;  %v1074_v48 = vld [vmem:[%s1435_s1 + $0xc2] ss:$0 sm:$0xff] }
 0x4c8   :  { %v277_v25 = vsel %vm276_vm13, %v1112_v43, %v273_v58  ;;  %922 = vmatpush.msra.mxu3 %v33_v51  ;;  %v29_v58 = vld [vmem:[%s1435_s1 + $0x60] sm:$0xff] }
 0x4c9   :  { %v282_v63 = vsel %vm279_vm14, %v281_v61, %v277_v25 }
 0x4ca   :  { %v284_v1 = vmul.f32 %v282_v63, %v1313_v8 }
 0x512   :  { %v736_v49 = vpop.permute.xlu0 %735 }
 0x513   :  { %v752_v55 = vsel %vm751_vm9, %v749_v54, %v736_v49  ;;  %v32_v49 = vld [vmem:[%s1435_s1 + $0x78] sm:$0xff] }
 0x514   :  { %923 = vmatpush.msra.mxu3 %v32_v49 }
 0x516   :  { %v744_v56 = vpop.permute.xlu2 %743  ;;  %924 = vmatpush.msra.mxu3 %v31_v52 }
 0x517   :  { %v755_v57 = vsel %vm754_vm10, %v752_v55, %v744_v56 }
 0x518   :  { %1048 = vmatmul.msk.f32.vlgmr.msrb.gmra.mxu2 %vm46_vm0, %v755_v57  ;;  %925 = vmatpush.msra.mxu3 %v30_v53 }
 0x51a   :  { %v730_v62 = vpop.permute.xlu0 %729  ;;  %926 = vmatpush.msra.mxu3 %v29_v58 }
 0x51b   :  { %v750_v4 = vsel %vm133_vm8, %v284_v1, %v730_v62 }
 0x51e   :  { %v738_v3 = vpop.permute.xlu1 %737 }
 0x51f   :  { %v753_v5 = vsel %vm751_vm9, %v750_v4, %v738_v3 }
 0x526   :  { %v746_v6 = vpop.permute.xlu0 %745 }
 0x527   :  { %v756_v7 = vsel %vm754_vm10, %v753_v5, %v746_v6  ;;  %vm904_vm10 = vcmask 523264  }
 0x528   :  { %1049 = vmatmul.msk.f32.gmra.mxu2 %vm46_vm0, %v756_v7 }
 0x59b   :  { %v780_v9 = vpop.f32.mrf.mxu2 }
 0x59c   :  { %v1347_v10 = vadd.f32 %v780_v9, %v1187_v0  ;;  %v24_v0 = vld [vmem:[%s1435_s1 + $0x38] sm:$0xff] }
 0x59d   :  { %843 = vmatpush.msrb.mxu0 %v24_v0 }
 0x59e   :  { %v788_v11 = vmul.f32 %v1347_v10, %v1347_v10 }
 0x59f   :  { %844 = vmatpush.msrb.mxu0 %v23_v17 }
 0x5a0   :  { %v790_v12 = vsel %vm46_vm0, %v788_v11, 0.0 }
 0x5a1   :  { %791 = vadd.xlane.f32.xlu1 %v790_v12 }
 0x5ab   :  { %v783_v8 = vpop.f32.mrf.mxu2 }
 0x5ac   :  { %v1353_v13 = vadd.f32 %v783_v8, %v1194_v2  ;;  %v22_v2 = vld [vmem:[%s1435_s1 + $0x28] sm:$0xff] }
 0x5ad   :  { %845 = vmatpush.msrb.mxu0 %v22_v2 }
 0x5ae   :  { %v789_v14 = vmul.f32 %v1353_v13, %v1353_v13 }
 0x5af   :  { %846 = vmatpush.msrb.mxu0 %v21_v18 }
 0x5b0   :  { %v793_v15 = vsel %vm46_vm0, %v789_v14, 0.0 }
 0x5b1   :  { %794 = vadd.xlane.f32.xlu0 %v793_v15 }
 0x614   :  { %v792_v20 = vpop.xlane.xlu1 %791 }
 0x615   :  { %v796_v21 = vmul.f32 %v792_v20, %v1212_v16 }
 0x617   :  { %v798_v22 = vadd.f32 1e-06, %v796_v21 }
 0x619   :  { %1113 = vrsqrt.f32 %v798_v22  ;;  %vm806_vm15 = vweird.f32 %v798_v22 }
 0x61f   :  { %v1114_v24 = vpop.eup %1113 }
 0x620   :  { %v801_v26 = vmul.f32 %v1114_v24, %v798_v22  ;;  %vm807_vm8 = vweird.f32 %v1114_v24 }
 0x621   :  { %vm808_vm1 = vmor %vm806_vm15, %vm807_vm8 }
 0x622   :  { %v802_v27 = vmul.f32 %v1114_v24, %v801_v26 }
 0x624   :  { %v795_v28 = vpop.xlane.xlu0 %794  ;;  %v803_v29 = vmul.f32 0.5, %v802_v27 }
 0x625   :  { %v797_v30 = vmul.f32 %v795_v28, %v1212_v16 }
 0x626   :  { %v804_v31 = vsub.f32 1.5, %v803_v29 }
 0x627   :  { %v799_v32 = vadd.f32 1e-06, %v797_v30 }
 0x628   :  { %v805_v33 = vmul.f32 %v1114_v24, %v804_v31 }
 0x629   :  { %1115 = vrsqrt.f32 %v799_v32  ;;  %vm816_vm3 = vweird.f32 %v799_v32 }
 0x62a   :  { %v809_v35 = vsel %vm808_vm1, %v1114_v24, %v805_v33 }
 0x62b   :  { %v820_v36 = vmul.f32 %v809_v35, %v1347_v10 }
 0x62d   :  { %v823_v37 = vmul.f32 %v1073_v34, %v820_v36  ;;  %v28_v36 = vld [vmem:[%s1435_s1 + $0x58] sm:$0xff] }
 0x62e   :  { %991 = vmatpush.msrb.mxu1 %v28_v36 }
 0x62f   :  { %v1116_v19 = vpop.eup %1115  ;;  %1050 = vmatmul.msk.f32.vlgmr.msrb.gmra.mxu0 %vm46_vm0, %v823_v37  ;;  %v26_v37 = vld [vmem:[%s1435_s1 + $0x48] sm:$0xff] }
 0x630   :  { %v811_v38 = vmul.f32 %v1116_v19, %v799_v32  ;;  %vm817_vm2 = vweird.f32 %v1116_v19 }
 0x631   :  { %vm818_vm4 = vmor %vm816_vm3, %vm817_vm2 }
 0x632   :  { %v812_v39 = vmul.f32 %v1116_v19, %v811_v38 }
 0x634   :  { %v813_v23 = vmul.f32 0.5, %v812_v39 }
 0x636   :  { %v814_v40 = vsub.f32 1.5, %v813_v23 }
 0x638   :  { %v815_v41 = vmul.f32 %v1116_v19, %v814_v40 }
 0x63a   :  { %v819_v42 = vsel %vm818_vm4, %v1116_v19, %v815_v41 }
 0x63b   :  { %v821_v43 = vmul.f32 %v819_v42, %v1353_v13 }
 0x63d   :  { %v824_v44 = vmul.f32 %v1073_v34, %v821_v43 }
 0x63f   :  { %1051 = vmatmul.msk.f32.gmra.mxu0 %vm46_vm0, %v824_v44 }
 0x6ac   :  { %v848_v45 = vpop.f32.mrf.mxu0 }
 0x6ad   :  { %896 = vrot.lane.b32.xlu2 %v848_v45, %s1156_s25  ;;  %v1052_v54 = vmul.f32 -1.442695, %v848_v45 }
 0x6af   :  { %1117 = vpow2.f32 %v1052_v54 }
 0x6b5   :  { %v1118_v55 = vpop.eup %1117 }
 0x6b6   :  { %v860_v56 = vadd.f32 1.0, %v1118_v55 }
 0x6b8   :  { %1119 = vrcp.f32 %v860_v56  ;;  %v873_v4 = vand.u32 2147483648, %v860_v56  ;;  %vm867_vm6 = vweird.f32 %v860_v56  ;;  %v871_v5 = vand.u32 2147483647, %v860_v56 }
 0x6ba   :  { %v874_v9 = vor.u32 1.1754944e-38, %v873_v4  ;;  %vm872_vm9 = vcmp.eq.f32.partialorder %v871_v5, 8.507059e+37 }
 0x6bc   :  { %v851_v50 = vpop.f32.mrf.mxu0 }
 0x6bd   :  { %898 = vrot.lane.b32.xlu2 %v851_v50, %s1156_s25  ;;  %v1053_v57 = vmul.f32 -1.442695, %v851_v50 }
 0x6be   :  { %v1120_v59 = vpop.eup %1119 }
 0x6bf   :  { %1121 = vpow2.f32 %v1053_v57  ;;  %v863_v25 = vmul.f32 %v1120_v59, %v860_v56  ;;  %vm868_vm5 = vweird.f32 %v1120_v59 }
 0x6c0   :  { %vm869_vm7 = vmor %vm867_vm6, %vm868_vm5 }
 0x6c1   :  { %v864_v62 = vsub.f32 1.0, %v863_v25 }
 0x6c3   :  { %v865_v63 = vmul.f32 %v1120_v59, %v864_v62 }
 0x6c5   :  { %v1122_v60 = vpop.eup %1121  ;;  %v866_v3 = vadd.f32 %v1120_v59, %v865_v63 }
 0x6c6   :  { %v861_v61 = vadd.f32 1.0, %v1122_v60 }
 0x6c7   :  { %v870_v7 = vsel %vm869_vm7, %v1120_v59, %v866_v3 }
 0x6c8   :  { %1123 = vrcp.f32 %v861_v61  ;;  %v875_v12 = vsel %vm872_vm9, %v874_v9, %v870_v7  ;;  %v888_v2 = vand.u32 2147483648, %v861_v61  ;;  %vm882_vm12 = vweird.f32 %v861_v61 }
 0x6c9   :  { %v892_v8 = vmul.f32 %v875_v12, %v848_v45  ;;  %v886_v18 = vand.u32 2147483647, %v861_v61 }
 0x6ca   :  { %v889_v21 = vor.u32 1.1754944e-38, %v888_v2 }
 0x6cb   :  { %vm887_vm14 = vcmp.eq.f32.partialorder %v886_v18, 8.507059e+37 }
 0x6ce   :  { %v1124_v1 = vpop.eup %1123 }
 0x6cf   :  { %v878_v6 = vmul.f32 %v1124_v1, %v861_v61  ;;  %vm883_vm11 = vweird.f32 %v1124_v1 }
 0x6d0   :  { %vm884_vm13 = vmor %vm882_vm12, %vm883_vm11 }
 0x6d1   :  { %v879_v11 = vsub.f32 1.0, %v878_v6 }
 0x6d3   :  { %v880_v14 = vmul.f32 %v1124_v1, %v879_v11 }
 0x6d5   :  { %v881_v17 = vadd.f32 %v1124_v1, %v880_v14 }
 0x6d7   :  { %v885_v20 = vsel %vm884_vm13, %v1124_v1, %v881_v17 }
 0x6d8   :  { %v890_v22 = vsel %vm887_vm14, %v889_v21, %v885_v20 }
 0x6d9   :  { %v893_v24 = vmul.f32 %v890_v22, %v851_v50 }
 0x707   :  { %v897_v15 = vpop.permute.xlu2 %896 }
 0x708   :  { %v902_v0 = vmul.f32 %v897_v15, %v892_v8 }
 0x70a   :  { %1054 = vmatmul.msk.f32.vlgmr.msra.gmra.mxu3 %vm904_vm10, %v902_v0 }
 0x717   :  { %v899_v26 = vpop.permute.xlu2 %898 }
 0x718   :  { %v903_v27 = vmul.f32 %v899_v26, %v893_v24 }
 0x71a   :  { %1055 = vmatmul.msk.f32.gmra.mxu3 %vm904_vm10, %v903_v27 }
 0x78d   :  { %v928_v28 = vpop.f32.mrf.mxu3 }
 0x78e   :  { %v934_v29 = vadd.f32 %v928_v28, %v1347_v10  ;;  %v27_v10 = vld [vmem:[%s1435_s1 + $0x50] sm:$0xff] }
 0x78f   :  { %992 = vmatpush.msrb.mxu1 %v27_v10 }
 0x790   :  { %v936_v30 = vmul.f32 %v934_v29, %v934_v29 }
 0x791   :  { %993 = vmatpush.msrb.mxu1 %v26_v37 }
 0x792   :  { %v938_v31 = vsel %vm46_vm0, %v936_v30, 0.0 }
 0x793   :  { %939 = vadd.xlane.f32.xlu2 %v938_v31 }
 0x79d   :  { %v931_v32 = vpop.f32.mrf.mxu3 }
 0x79e   :  { %v935_v33 = vadd.f32 %v931_v32, %v1353_v13  ;;  %v25_v13 = vld [vmem:[%s1435_s1 + $0x40] sm:$0xff] }
 0x79f   :  { %994 = vmatpush.msrb.mxu1 %v25_v13 }
 0x7a0   :  { %v937_v34 = vmul.f32 %v935_v33, %v935_v33 }
 0x7a2   :  { %v941_v35 = vsel %vm46_vm0, %v937_v34, 0.0 }
 0x7a3   :  { %942 = vadd.xlane.f32.xlu1 %v941_v35 }
 0x806   :  { %v940_v19 = vpop.xlane.xlu2 %939 }
 0x807   :  { %v944_v38 = vmul.f32 %v940_v19, %v1212_v16 }
 0x809   :  { %v946_v39 = vadd.f32 1e-06, %v944_v38 }
 0x80b   :  { %1125 = vrsqrt.f32 %v946_v39  ;;  %vm954_vm15 = vweird.f32 %v946_v39 }
 0x811   :  { %v1126_v23 = vpop.eup %1125 }
 0x812   :  { %v949_v40 = vmul.f32 %v1126_v23, %v946_v39  ;;  %vm955_vm8 = vweird.f32 %v1126_v23 }
 0x813   :  { %vm956_vm1 = vmor %vm954_vm15, %vm955_vm8 }
 0x814   :  { %v950_v41 = vmul.f32 %v1126_v23, %v949_v40 }
 0x816   :  { %v943_v42 = vpop.xlane.xlu1 %942  ;;  %v951_v43 = vmul.f32 0.5, %v950_v41 }
 0x817   :  { %v945_v44 = vmul.f32 %v943_v42, %v1212_v16 }
 0x818   :  { %v952_v45 = vsub.f32 1.5, %v951_v43 }
 0x819   :  { %v947_v46 = vadd.f32 1e-06, %v945_v44 }
 0x81a   :  { %v953_v47 = vmul.f32 %v1126_v23, %v952_v45 }
 0x81b   :  { %1127 = vrsqrt.f32 %v947_v46  ;;  %vm964_vm3 = vweird.f32 %v947_v46 }
 0x81c   :  { %v957_v50 = vsel %vm956_vm1, %v1126_v23, %v953_v47 }
 0x81d   :  { %v968_v51 = vmul.f32 %v957_v50, %v934_v29 }
 0x81f   :  { %v971_v49 = vmul.f32 %v1074_v48, %v968_v51 }
 0x821   :  { %v1128_v52 = vpop.eup %1127  ;;  %1056 = vmatmul.msk.f32.vlgmr.msrb.gmra.mxu1 %vm46_vm0, %v971_v49 }
 0x822   :  { %v959_v53 = vmul.f32 %v1128_v52, %v947_v46  ;;  %vm965_vm2 = vweird.f32 %v1128_v52 }
 0x823   :  { %vm966_vm4 = vmor %vm964_vm3, %vm965_vm2 }
 0x824   :  { %v960_v54 = vmul.f32 %v1128_v52, %v959_v53 }
 0x826   :  { %v961_v16 = vmul.f32 0.5, %v960_v54 }
 0x828   :  { %v962_v55 = vsub.f32 1.5, %v961_v16 }
 0x82a   :  { %v963_v56 = vmul.f32 %v1128_v52, %v962_v55 }
 0x82c   :  { %v967_v57 = vsel %vm966_vm4, %v1128_v52, %v963_v56 }
 0x82d   :  { %v969_v58 = vmul.f32 %v967_v57, %v935_v33 }
 0x82f   :  { %v972_v59 = vmul.f32 %v1074_v48, %v969_v58 }
 0x831   :  { %1057 = vmatmul.msk.f32.gmra.mxu1 %vm46_vm0, %v972_v59 }
 0x89e   :  { %v996_v60 = vpop.f32.mrf.mxu1 }
 0x89f   :  { %1002 = vst [vmem:[#allocation2] sm:$0xff] %v996_v60 }
 0x8ae   :  { %v999_v25 = vpop.f32.mrf.mxu1 }
 0x8af   :  { %1003 = vst [vmem:[#allocation2 + $0x8] sm:$0xff] %v999_v25 }
 0x8b0   :  { %1016 = dma.vmem_to_hbm [thread:$0]  %s1009_s3, 256, %s1011_s29, [#allocation3], %s1168_s4, %s1168_s4, %s1164_s8  }
 0x8b1   :  { %1153 = dma.done.wait [#allocation3], 256  }
 0x8b2   :  { %1154 = vsyncadd [#allocation3], 4294967040 }
 0x8b3   :  { %1021 = vsyncpa [#allocation3], 1 }

</bundles_post_ra>
